<compile_context>
chip_gen: v7x
topology: tpu7x:2x2x1
jax: 0.10.0
libtpu: 0.0.40
codegen_flags: <defaults>
</compile_context>

<pallas_src>
import functools

import jax
import jax.numpy as jnp
from jax.experimental import pallas as pl
from jax.experimental.pallas import tpu as pltpu


# ----------------------------- Pallas kernel ------------------------------ #
def _make_gru_kernel(num_layers: int, hidden_size: int, seq_len: int, batch: int):
    H = hidden_size
    T = seq_len
    B = batch

    def kernel(*refs):
        # refs: x, then 4 refs per GRU layer (wih, whh, b_x_fused, b_hn),
        # then fc1w, fc1b, fc2w, fc2b, out.
        x_ref = refs[0]
        idx = 1
        layer_refs = []
        for _ in range(num_layers):
            layer_refs.append(refs[idx:idx + 4])
            idx += 4
        fc1w_ref, fc1b_ref, fc2w_ref, fc2b_ref = refs[idx:idx + 4]
        out_ref = refs[idx + 4]

        # Load weights once; hoist bias broadcasts to (B, ...) ONCE (JAX does
        # not CSE broadcast_in_dim inside the unrolled loop).
        layer_w = []
        for (wih_ref, whh_ref, bx_ref, bhn_ref) in layer_refs:
            wih = wih_ref[...]                                       # (in_l, 3H)
            whh = whh_ref[...]                                       # (H, 3H)
            bx_b = jnp.broadcast_to(bx_ref[...], (B, 3 * H))         # fused bias
            bhn_b = jnp.broadcast_to(bhn_ref[...], (B, H))           # b_hh[n]
            layer_w.append((wih, whh, bx_b, bhn_b))

        # Layer 0 (input_size == 1): precompute gate pre-activations for ALL
        # timesteps in one shot: (B, T, 1) * (1, 1, 3H) + bias -> (B, T, 3H).
        wih0, _, bx0_b, _ = layer_w[0]
        x = x_ref[...]                                               # (B, T)
        gx0_all = x[:, :, None] * wih0.reshape(1, 1, 3 * H) + bx0_b[:, None, :]

        hs = [jnp.zeros((B, H), jnp.float32) for _ in range(num_layers)]

        # Fully unrolled time loop (T small & static) for cross-step ILP.
        for t in range(T):
            inp = None
            for l in range(num_layers):
                wih, whh, bx_b, bhn_b = layer_w[l]
                h_prev = hs[l]
                if l == 0:
                    gx = gx0_all[:, t, :]                            # bias pre-fused
                else:
                    gx = jnp.dot(inp, wih,
                                 preferred_element_type=jnp.float32) + bx_b
                gh = jnp.dot(h_prev, whh,
                             preferred_element_type=jnp.float32)     # no bias

                rz = jax.nn.sigmoid(gx[:, :2 * H] + gh[:, :2 * H])
                r = rz[:, :H]
                z = rz[:, H:2 * H]
                n = jnp.tanh(gx[:, 2 * H:] + r * (gh[:, 2 * H:] + bhn_b))
                h_new = (1.0 - z) * n + z * h_prev

                hs[l] = h_new
                inp = h_new

        # FC head per layer; write rows of out_ref with static slices (no
        # sublane concatenation of the final hidden states).
        fc1w = fc1w_ref[...]
        fc1b = fc1b_ref[...]
        fc2w = fc2w_ref[...]
        fc2b = fc2b_ref[...]
        for l in range(num_layers):
            o = jnp.dot(hs[l], fc1w, preferred_element_type=jnp.float32) + fc1b
            o = jnp.maximum(o, 0.0)                                  # ReLU
            logits = jnp.dot(o, fc2w, preferred_element_type=jnp.float32) + fc2b
            out_ref[l * B:(l + 1) * B, :] = logits.astype(out_ref.dtype)

    return kernel


# --------------------- One-time parameter preparation ----------------------- #
def prepare_params(params, *, num_layers, hidden_size):
    """Pre-transpose weights and fuse biases ONCE (outside the hot path)."""
    H = hidden_size
    flat = []
    for l in range(num_layers):
        w_ih, w_hh, b_ih, b_hh = params["gru"][l]
        # Fused input-path bias: r/z columns get b_ih+b_hh; n column gets b_ih.
        b_x = jnp.concatenate(
            [b_ih[:2 * H] + b_hh[:2 * H], b_ih[2 * H:]]).reshape(1, 3 * H)
        b_hn = b_hh[2 * H:].reshape(1, H)
        flat += [
            jnp.transpose(w_ih),          # (in_l, 3H)
            jnp.transpose(w_hh),          # (H, 3H)
            b_x,                          # (1, 3H)  fused
            b_hn,                         # (1, H)
        ]
    flat += [
        jnp.transpose(params["fc1_w"]),   # (H, 20)
        params["fc1_b"].reshape(1, -1),
        jnp.transpose(params["fc2_w"]),   # (20, C)
        params["fc2_b"].reshape(1, -1),
    ]
    return flat


# ------------------------------- Wrapper ----------------------------------- #
@functools.partial(jax.jit,
                   static_argnames=("num_layers", "hidden_size", "num_classes"))
def gru_predictor_forward(x, flat_params, *, num_layers, hidden_size,
                          num_classes):
    """x: (B, T) float32.  Returns (num_layers * B, num_classes)."""
    B, T = x.shape
    kernel = _make_gru_kernel(num_layers, hidden_size, T, B)
    vmem = pl.BlockSpec(memory_space=pltpu.MemorySpace.VMEM)

    out = pl.pallas_call(
        kernel,
        out_shape=jax.ShapeDtypeStruct((num_layers * B, num_classes),
                                       jnp.float32),
        in_specs=[vmem] * (1 + len(flat_params)),
        out_specs=vmem,
    )(x, *flat_params)
    return out


# --------------------------- Parameter creation ----------------------------- #
def init_params(key, *, num_layers, hidden_size, input_size, num_classes):
    H = hidden_size
    k = 1.0 / jnp.sqrt(jnp.float32(H))
    params = {"gru": []}
    keys = jax.random.split(key, 4 * num_layers + 4)
    ki = 0
    for l in range(num_layers):
        in_l = input_size if l == 0 else H
        w_ih = jax.random.uniform(keys[ki], (3 * H, in_l), jnp.float32, -k, k); ki += 1
        w_hh = jax.random.uniform(keys[ki], (3 * H, H), jnp.float32, -k, k); ki += 1
        b_ih = jax.random.uniform(keys[ki], (3 * H,), jnp.float32, -k, k); ki += 1
        b_hh = jax.random.uniform(keys[ki], (3 * H,), jnp.float32, -k, k); ki += 1
        params["gru"].append((w_ih, w_hh, b_ih, b_hh))
    k1 = 1.0 / jnp.sqrt(jnp.float32(H))
    params["fc1_w"] = jax.random.uniform(keys[ki], (20, H), jnp.float32, -k1, k1); ki += 1
    params["fc1_b"] = jax.random.uniform(keys[ki], (20,), jnp.float32, -k1, k1); ki += 1
    k2 = 1.0 / jnp.sqrt(jnp.float32(20))
    params["fc2_w"] = jax.random.uniform(keys[ki], (num_classes, 20), jnp.float32, -k2, k2); ki += 1
    params["fc2_b"] = jax.random.uniform(keys[ki], (num_classes,), jnp.float32, -k2, k2); ki += 1
    return params


# ------------------------- Pure-JAX reference (check) ----------------------- #
def reference_forward(x, params, *, num_layers, hidden_size, num_classes):
    B, T = x.shape
    H = hidden_size
    xs = x[:, :, None]                                     # (B, T, 1)
    hs = [jnp.zeros((B, H), jnp.float32) for _ in range(num_layers)]
    for t in range(T):
        inp = xs[:, t, :]
        for l in range(num_layers):
            w_ih, w_hh, b_ih, b_hh = params["gru"][l]
            gx = inp @ w_ih.T + b_ih
            gh = hs[l] @ w_hh.T + b_hh
            r = jax.nn.sigmoid(gx[:, 0:H] + gh[:, 0:H])
            z = jax.nn.sigmoid(gx[:, H:2 * H] + gh[:, H:2 * H])
            n = jnp.tanh(gx[:, 2 * H:] + r * gh[:, 2 * H:])
            hs[l] = (1.0 - z) * n + z * hs[l]
            inp = hs[l]
    h_out = jnp.concatenate(hs, axis=0)
    o = jnp.maximum(h_out @ params["fc1_w"].T + params["fc1_b"], 0.0)
    return o @ params["fc2_w"].T + params["fc2_b"]


# ---------------------------------- Main ------------------------------------ #
if __name__ == "__main__":
    SEQ_LEN = 8
    NUM_LAYERS = 2
    HIDDEN = 32
    INPUT_SIZE = 1
    NUM_CLASSES = 56
    BATCH = 2

    key = jax.random.PRNGKey(0)
    k_x, k_p = jax.random.split(key)
    x = jax.random.normal(k_x, (BATCH, SEQ_LEN), jnp.float32)
    params = init_params(k_p, num_layers=NUM_LAYERS, hidden_size=HIDDEN,
                         input_size=INPUT_SIZE, num_classes=NUM_CLASSES)

    # One-time weight prep (transposes + bias fusion) outside the hot path.
    flat_params = prepare_params(params, num_layers=NUM_LAYERS,
                                 hidden_size=HIDDEN)

    out = gru_predictor_forward(x, flat_params, num_layers=NUM_LAYERS,
                                hidden_size=HIDDEN, num_classes=NUM_CLASSES)
    out = jax.block_until_ready(out)

    ref = reference_forward(x, params, num_layers=NUM_LAYERS,
                            hidden_size=HIDDEN, num_classes=NUM_CLASSES)
    assert out.shape == (NUM_LAYERS * BATCH, NUM_CLASSES)
    assert jnp.allclose(out, ref, atol=1e-4, rtol=1e-4), "mismatch vs JAX reference"

    print("KERNEL_OK")
</pallas_src>

<mosaic_0001>
module attributes {stable_mosaic.version = 11 : i64} {
  func.func @kernel(%arg0: memref<2x8xf32, #tpu.memory_space<vmem>>, %arg1: memref<1x96xf32, #tpu.memory_space<vmem>>, %arg2: memref<32x96xf32, #tpu.memory_space<vmem>>, %arg3: memref<1x96xf32, #tpu.memory_space<vmem>>, %arg4: memref<1x32xf32, #tpu.memory_space<vmem>>, %arg5: memref<32x96xf32, #tpu.memory_space<vmem>>, %arg6: memref<32x96xf32, #tpu.memory_space<vmem>>, %arg7: memref<1x96xf32, #tpu.memory_space<vmem>>, %arg8: memref<1x32xf32, #tpu.memory_space<vmem>>, %arg9: memref<32x20xf32, #tpu.memory_space<vmem>>, %arg10: memref<1x20xf32, #tpu.memory_space<vmem>>, %arg11: memref<20x56xf32, #tpu.memory_space<vmem>>, %arg12: memref<1x56xf32, #tpu.memory_space<vmem>>, %arg13: memref<4x56xf32, #tpu.memory_space<vmem>>) attributes {dimension_semantics = [], scalar_prefetch = 0 : i64, scratch_operands = 0 : i64, tpu.core_type = #tpu.core_type<tc>} {
    %c0 = arith.constant 0 : index
    %c0_0 = arith.constant 0 : index
    %0 = vector.load %arg1[%c0, %c0_0] : memref<1x96xf32, #tpu.memory_space<vmem>>, vector<1x96xf32>
    %c0_1 = arith.constant 0 : index
    %c0_2 = arith.constant 0 : index
    %1 = vector.load %arg2[%c0_1, %c0_2] : memref<32x96xf32, #tpu.memory_space<vmem>>, vector<32x96xf32>
    %c0_3 = arith.constant 0 : index
    %c0_4 = arith.constant 0 : index
    %2 = vector.load %arg3[%c0_3, %c0_4] : memref<1x96xf32, #tpu.memory_space<vmem>>, vector<1x96xf32>
    %3 = vector.shape_cast %2 : vector<1x96xf32> to vector<1x96xf32>
    %4 = vector.broadcast %3 : vector<1x96xf32> to vector<2x96xf32>
    %c0_5 = arith.constant 0 : index
    %c0_6 = arith.constant 0 : index
    %5 = vector.load %arg4[%c0_5, %c0_6] : memref<1x32xf32, #tpu.memory_space<vmem>>, vector<1x32xf32>
    %6 = vector.shape_cast %5 : vector<1x32xf32> to vector<1x32xf32>
    %7 = vector.broadcast %6 : vector<1x32xf32> to vector<2x32xf32>
    %c0_7 = arith.constant 0 : index
    %c0_8 = arith.constant 0 : index
    %8 = vector.load %arg5[%c0_7, %c0_8] : memref<32x96xf32, #tpu.memory_space<vmem>>, vector<32x96xf32>
    %c0_9 = arith.constant 0 : index
    %c0_10 = arith.constant 0 : index
    %9 = vector.load %arg6[%c0_9, %c0_10] : memref<32x96xf32, #tpu.memory_space<vmem>>, vector<32x96xf32>
    %c0_11 = arith.constant 0 : index
    %c0_12 = arith.constant 0 : index
    %10 = vector.load %arg7[%c0_11, %c0_12] : memref<1x96xf32, #tpu.memory_space<vmem>>, vector<1x96xf32>
    %11 = vector.shape_cast %10 : vector<1x96xf32> to vector<1x96xf32>
    %12 = vector.broadcast %11 : vector<1x96xf32> to vector<2x96xf32>
    %c0_13 = arith.constant 0 : index
    %c0_14 = arith.constant 0 : index
    %13 = vector.load %arg8[%c0_13, %c0_14] : memref<1x32xf32, #tpu.memory_space<vmem>>, vector<1x32xf32>
    %14 = vector.shape_cast %13 : vector<1x32xf32> to vector<1x32xf32>
    %15 = vector.broadcast %14 : vector<1x32xf32> to vector<2x32xf32>
    %c0_15 = arith.constant 0 : index
    %c0_16 = arith.constant 0 : index
    %16 = vector.load %arg0[%c0_15, %c0_16] : memref<2x8xf32, #tpu.memory_space<vmem>>, vector<2x8xf32>
    %17 = vector.shape_cast %16 : vector<2x8xf32> to vector<2x8x1xf32>
    %18 = vector.shape_cast %0 : vector<1x96xf32> to vector<1x1x96xf32>
    %19 = vector.broadcast %17 : vector<2x8x1xf32> to vector<2x8x96xf32>
    %20 = vector.broadcast %18 : vector<1x1x96xf32> to vector<2x8x96xf32>
    %21 = arith.mulf %19, %20 : vector<2x8x96xf32>
    %22 = vector.shape_cast %4 : vector<2x96xf32> to vector<2x1x96xf32>
    %23 = vector.broadcast %22 : vector<2x1x96xf32> to vector<2x8x96xf32>
    %24 = arith.addf %21, %23 : vector<2x8x96xf32>
    %cst = arith.constant 0.000000e+00 : f32
    %25 = vector.broadcast %cst : f32 to vector<2x32xf32>
    %cst_17 = arith.constant 0.000000e+00 : f32
    %26 = vector.broadcast %cst_17 : f32 to vector<2x32xf32>
    %27 = vector.extract_strided_slice %24 {offsets = [0, 0, 0], sizes = [2, 1, 96], strides = [1, 1, 1]} : vector<2x8x96xf32> to vector<2x1x96xf32>
    %28 = vector.shape_cast %27 : vector<2x1x96xf32> to vector<2x96xf32>
    %cst_18 = arith.constant dense<0.000000e+00> : vector<2x96xf32>
    %29 = tpu.matmul %25, %1, %cst_18 {dimension_numbers = #tpu.dot_dimension_numbers<[1], [0], [0], [1], [0, 0, 1, 1], [], []>} : vector<2x32xf32>, vector<32x96xf32>, vector<2x96xf32> -> vector<2x96xf32>
    %30 = vector.extract_strided_slice %28 {offsets = [0, 0], sizes = [2, 64], strides = [1, 1]} : vector<2x96xf32> to vector<2x64xf32>
    %31 = vector.extract_strided_slice %29 {offsets = [0, 0], sizes = [2, 64], strides = [1, 1]} : vector<2x96xf32> to vector<2x64xf32>
    %32 = arith.addf %30, %31 : vector<2x64xf32>
    %33 = arith.negf %32 : vector<2x64xf32>
    %34 = math.exp %33 : vector<2x64xf32>
    %cst_19 = arith.constant 1.000000e+00 : f32
    %35 = vector.broadcast %cst_19 : f32 to vector<2x64xf32>
    %36 = arith.addf %35, %34 : vector<2x64xf32>
    %37 = arith.divf %35, %36 : vector<2x64xf32>
    %38 = vector.extract_strided_slice %37 {offsets = [0, 0], sizes = [2, 32], strides = [1, 1]} : vector<2x64xf32> to vector<2x32xf32>
    %39 = vector.extract_strided_slice %37 {offsets = [0, 32], sizes = [2, 32], strides = [1, 1]} : vector<2x64xf32> to vector<2x32xf32>
    %40 = vector.extract_strided_slice %28 {offsets = [0, 64], sizes = [2, 32], strides = [1, 1]} : vector<2x96xf32> to vector<2x32xf32>
    %41 = vector.extract_strided_slice %29 {offsets = [0, 64], sizes = [2, 32], strides = [1, 1]} : vector<2x96xf32> to vector<2x32xf32>
    %42 = arith.addf %41, %7 : vector<2x32xf32>
    %43 = arith.mulf %38, %42 : vector<2x32xf32>
    %44 = arith.addf %40, %43 : vector<2x32xf32>
    %45 = math.tanh %44 : vector<2x32xf32>
    %cst_20 = arith.constant 1.000000e+00 : f32
    %46 = vector.broadcast %cst_20 : f32 to vector<2x32xf32>
    %47 = arith.subf %46, %39 : vector<2x32xf32>
    %48 = arith.mulf %47, %45 : vector<2x32xf32>
    %49 = arith.mulf %39, %25 : vector<2x32xf32>
    %50 = arith.addf %48, %49 : vector<2x32xf32>
    %cst_21 = arith.constant dense<0.000000e+00> : vector<2x96xf32>
    %51 = tpu.matmul %50, %8, %cst_21 {dimension_numbers = #tpu.dot_dimension_numbers<[1], [0], [0], [1], [0, 0, 1, 1], [], []>} : vector<2x32xf32>, vector<32x96xf32>, vector<2x96xf32> -> vector<2x96xf32>
    %52 = arith.addf %51, %12 : vector<2x96xf32>
    %cst_22 = arith.constant dense<0.000000e+00> : vector<2x96xf32>
    %53 = tpu.matmul %26, %9, %cst_22 {dimension_numbers = #tpu.dot_dimension_numbers<[1], [0], [0], [1], [0, 0, 1, 1], [], []>} : vector<2x32xf32>, vector<32x96xf32>, vector<2x96xf32> -> vector<2x96xf32>
    %54 = vector.extract_strided_slice %52 {offsets = [0, 0], sizes = [2, 64], strides = [1, 1]} : vector<2x96xf32> to vector<2x64xf32>
    %55 = vector.extract_strided_slice %53 {offsets = [0, 0], sizes = [2, 64], strides = [1, 1]} : vector<2x96xf32> to vector<2x64xf32>
    %56 = arith.addf %54, %55 : vector<2x64xf32>
    %57 = arith.negf %56 : vector<2x64xf32>
    %58 = math.exp %57 : vector<2x64xf32>
    %cst_23 = arith.constant 1.000000e+00 : f32
    %59 = vector.broadcast %cst_23 : f32 to vector<2x64xf32>
    %60 = arith.addf %59, %58 : vector<2x64xf32>
    %61 = arith.divf %59, %60 : vector<2x64xf32>
    %62 = vector.extract_strided_slice %61 {offsets = [0, 0], sizes = [2, 32], strides = [1, 1]} : vector<2x64xf32> to vector<2x32xf32>
    %63 = vector.extract_strided_slice %61 {offsets = [0, 32], sizes = [2, 32], strides = [1, 1]} : vector<2x64xf32> to vector<2x32xf32>
    %64 = vector.extract_strided_slice %52 {offsets = [0, 64], sizes = [2, 32], strides = [1, 1]} : vector<2x96xf32> to vector<2x32xf32>
    %65 = vector.extract_strided_slice %53 {offsets = [0, 64], sizes = [2, 32], strides = [1, 1]} : vector<2x96xf32> to vector<2x32xf32>
    %66 = arith.addf %65, %15 : vector<2x32xf32>
    %67 = arith.mulf %62, %66 : vector<2x32xf32>
    %68 = arith.addf %64, %67 : vector<2x32xf32>
    %69 = math.tanh %68 : vector<2x32xf32>
    %cst_24 = arith.constant 1.000000e+00 : f32
    %70 = vector.broadcast %cst_24 : f32 to vector<2x32xf32>
    %71 = arith.subf %70, %63 : vector<2x32xf32>
    %72 = arith.mulf %71, %69 : vector<2x32xf32>
    %73 = arith.mulf %63, %26 : vector<2x32xf32>
    %74 = arith.addf %72, %73 : vector<2x32xf32>
    %75 = vector.extract_strided_slice %24 {offsets = [0, 1, 0], sizes = [2, 1, 96], strides = [1, 1, 1]} : vector<2x8x96xf32> to vector<2x1x96xf32>
    %76 = vector.shape_cast %75 : vector<2x1x96xf32> to vector<2x96xf32>
    %cst_25 = arith.constant dense<0.000000e+00> : vector<2x96xf32>
    %77 = tpu.matmul %50, %1, %cst_25 {dimension_numbers = #tpu.dot_dimension_numbers<[1], [0], [0], [1], [0, 0, 1, 1], [], []>} : vector<2x32xf32>, vector<32x96xf32>, vector<2x96xf32> -> vector<2x96xf32>
    %78 = vector.extract_strided_slice %76 {offsets = [0, 0], sizes = [2, 64], strides = [1, 1]} : vector<2x96xf32> to vector<2x64xf32>
    %79 = vector.extract_strided_slice %77 {offsets = [0, 0], sizes = [2, 64], strides = [1, 1]} : vector<2x96xf32> to vector<2x64xf32>
    %80 = arith.addf %78, %79 : vector<2x64xf32>
    %81 = arith.negf %80 : vector<2x64xf32>
    %82 = math.exp %81 : vector<2x64xf32>
    %cst_26 = arith.constant 1.000000e+00 : f32
    %83 = vector.broadcast %cst_26 : f32 to vector<2x64xf32>
    %84 = arith.addf %83, %82 : vector<2x64xf32>
    %85 = arith.divf %83, %84 : vector<2x64xf32>
    %86 = vector.extract_strided_slice %85 {offsets = [0, 0], sizes = [2, 32], strides = [1, 1]} : vector<2x64xf32> to vector<2x32xf32>
    %87 = vector.extract_strided_slice %85 {offsets = [0, 32], sizes = [2, 32], strides = [1, 1]} : vector<2x64xf32> to vector<2x32xf32>
    %88 = vector.extract_strided_slice %76 {offsets = [0, 64], sizes = [2, 32], strides = [1, 1]} : vector<2x96xf32> to vector<2x32xf32>
    %89 = vector.extract_strided_slice %77 {offsets = [0, 64], sizes = [2, 32], strides = [1, 1]} : vector<2x96xf32> to vector<2x32xf32>
    %90 = arith.addf %89, %7 : vector<2x32xf32>
    %91 = arith.mulf %86, %90 : vector<2x32xf32>
    %92 = arith.addf %88, %91 : vector<2x32xf32>
    %93 = math.tanh %92 : vector<2x32xf32>
    %cst_27 = arith.constant 1.000000e+00 : f32
    %94 = vector.broadcast %cst_27 : f32 to vector<2x32xf32>
    %95 = arith.subf %94, %87 : vector<2x32xf32>
    %96 = arith.mulf %95, %93 : vector<2x32xf32>
    %97 = arith.mulf %87, %50 : vector<2x32xf32>
    %98 = arith.addf %96, %97 : vector<2x32xf32>
    %cst_28 = arith.constant dense<0.000000e+00> : vector<2x96xf32>
    %99 = tpu.matmul %98, %8, %cst_28 {dimension_numbers = #tpu.dot_dimension_numbers<[1], [0], [0], [1], [0, 0, 1, 1], [], []>} : vector<2x32xf32>, vector<32x96xf32>, vector<2x96xf32> -> vector<2x96xf32>
    %100 = arith.addf %99, %12 : vector<2x96xf32>
    %cst_29 = arith.constant dense<0.000000e+00> : vector<2x96xf32>
    %101 = tpu.matmul %74, %9, %cst_29 {dimension_numbers = #tpu.dot_dimension_numbers<[1], [0], [0], [1], [0, 0, 1, 1], [], []>} : vector<2x32xf32>, vector<32x96xf32>, vector<2x96xf32> -> vector<2x96xf32>
    %102 = vector.extract_strided_slice %100 {offsets = [0, 0], sizes = [2, 64], strides = [1, 1]} : vector<2x96xf32> to vector<2x64xf32>
    %103 = vector.extract_strided_slice %101 {offsets = [0, 0], sizes = [2, 64], strides = [1, 1]} : vector<2x96xf32> to vector<2x64xf32>
    %104 = arith.addf %102, %103 : vector<2x64xf32>
    %105 = arith.negf %104 : vector<2x64xf32>
    %106 = math.exp %105 : vector<2x64xf32>
    %cst_30 = arith.constant 1.000000e+00 : f32
    %107 = vector.broadcast %cst_30 : f32 to vector<2x64xf32>
    %108 = arith.addf %107, %106 : vector<2x64xf32>
    %109 = arith.divf %107, %108 : vector<2x64xf32>
    %110 = vector.extract_strided_slice %109 {offsets = [0, 0], sizes = [2, 32], strides = [1, 1]} : vector<2x64xf32> to vector<2x32xf32>
    %111 = vector.extract_strided_slice %109 {offsets = [0, 32], sizes = [2, 32], strides = [1, 1]} : vector<2x64xf32> to vector<2x32xf32>
    %112 = vector.extract_strided_slice %100 {offsets = [0, 64], sizes = [2, 32], strides = [1, 1]} : vector<2x96xf32> to vector<2x32xf32>
    %113 = vector.extract_strided_slice %101 {offsets = [0, 64], sizes = [2, 32], strides = [1, 1]} : vector<2x96xf32> to vector<2x32xf32>
    %114 = arith.addf %113, %15 : vector<2x32xf32>
    %115 = arith.mulf %110, %114 : vector<2x32xf32>
    %116 = arith.addf %112, %115 : vector<2x32xf32>
    %117 = math.tanh %116 : vector<2x32xf32>
    %cst_31 = arith.constant 1.000000e+00 : f32
    %118 = vector.broadcast %cst_31 : f32 to vector<2x32xf32>
    %119 = arith.subf %118, %111 : vector<2x32xf32>
    %120 = arith.mulf %119, %117 : vector<2x32xf32>
    %121 = arith.mulf %111, %74 : vector<2x32xf32>
    %122 = arith.addf %120, %121 : vector<2x32xf32>
    %123 = vector.extract_strided_slice %24 {offsets = [0, 2, 0], sizes = [2, 1, 96], strides = [1, 1, 1]} : vector<2x8x96xf32> to vector<2x1x96xf32>
    %124 = vector.shape_cast %123 : vector<2x1x96xf32> to vector<2x96xf32>
    %cst_32 = arith.constant dense<0.000000e+00> : vector<2x96xf32>
    %125 = tpu.matmul %98, %1, %cst_32 {dimension_numbers = #tpu.dot_dimension_numbers<[1], [0], [0], [1], [0, 0, 1, 1], [], []>} : vector<2x32xf32>, vector<32x96xf32>, vector<2x96xf32> -> vector<2x96xf32>
    %126 = vector.extract_strided_slice %124 {offsets = [0, 0], sizes = [2, 64], strides = [1, 1]} : vector<2x96xf32> to vector<2x64xf32>
    %127 = vector.extract_strided_slice %125 {offsets = [0, 0], sizes = [2, 64], strides = [1, 1]} : vector<2x96xf32> to vector<2x64xf32>
    %128 = arith.addf %126, %127 : vector<2x64xf32>
    %129 = arith.negf %128 : vector<2x64xf32>
    %130 = math.exp %129 : vector<2x64xf32>
    %cst_33 = arith.constant 1.000000e+00 : f32
    %131 = vector.broadcast %cst_33 : f32 to vector<2x64xf32>
    %132 = arith.addf %131, %130 : vector<2x64xf32>
    %133 = arith.divf %131, %132 : vector<2x64xf32>
    %134 = vector.extract_strided_slice %133 {offsets = [0, 0], sizes = [2, 32], strides = [1, 1]} : vector<2x64xf32> to vector<2x32xf32>
    %135 = vector.extract_strided_slice %133 {offsets = [0, 32], sizes = [2, 32], strides = [1, 1]} : vector<2x64xf32> to vector<2x32xf32>
    %136 = vector.extract_strided_slice %124 {offsets = [0, 64], sizes = [2, 32], strides = [1, 1]} : vector<2x96xf32> to vector<2x32xf32>
    %137 = vector.extract_strided_slice %125 {offsets = [0, 64], sizes = [2, 32], strides = [1, 1]} : vector<2x96xf32> to vector<2x32xf32>
    %138 = arith.addf %137, %7 : vector<2x32xf32>
    %139 = arith.mulf %134, %138 : vector<2x32xf32>
    %140 = arith.addf %136, %139 : vector<2x32xf32>
    %141 = math.tanh %140 : vector<2x32xf32>
    %cst_34 = arith.constant 1.000000e+00 : f32
    %142 = vector.broadcast %cst_34 : f32 to vector<2x32xf32>
    %143 = arith.subf %142, %135 : vector<2x32xf32>
    %144 = arith.mulf %143, %141 : vector<2x32xf32>
    %145 = arith.mulf %135, %98 : vector<2x32xf32>
    %146 = arith.addf %144, %145 : vector<2x32xf32>
    %cst_35 = arith.constant dense<0.000000e+00> : vector<2x96xf32>
    %147 = tpu.matmul %146, %8, %cst_35 {dimension_numbers = #tpu.dot_dimension_numbers<[1], [0], [0], [1], [0, 0, 1, 1], [], []>} : vector<2x32xf32>, vector<32x96xf32>, vector<2x96xf32> -> vector<2x96xf32>
    %148 = arith.addf %147, %12 : vector<2x96xf32>
    %cst_36 = arith.constant dense<0.000000e+00> : vector<2x96xf32>
    %149 = tpu.matmul %122, %9, %cst_36 {dimension_numbers = #tpu.dot_dimension_numbers<[1], [0], [0], [1], [0, 0, 1, 1], [], []>} : vector<2x32xf32>, vector<32x96xf32>, vector<2x96xf32> -> vector<2x96xf32>
    %150 = vector.extract_strided_slice %148 {offsets = [0, 0], sizes = [2, 64], strides = [1, 1]} : vector<2x96xf32> to vector<2x64xf32>
    %151 = vector.extract_strided_slice %149 {offsets = [0, 0], sizes = [2, 64], strides = [1, 1]} : vector<2x96xf32> to vector<2x64xf32>
    %152 = arith.addf %150, %151 : vector<2x64xf32>
    %153 = arith.negf %152 : vector<2x64xf32>
    %154 = math.exp %153 : vector<2x64xf32>
    %cst_37 = arith.constant 1.000000e+00 : f32
    %155 = vector.broadcast %cst_37 : f32 to vector<2x64xf32>
    %156 = arith.addf %155, %154 : vector<2x64xf32>
    %157 = arith.divf %155, %156 : vector<2x64xf32>
    %158 = vector.extract_strided_slice %157 {offsets = [0, 0], sizes = [2, 32], strides = [1, 1]} : vector<2x64xf32> to vector<2x32xf32>
    %159 = vector.extract_strided_slice %157 {offsets = [0, 32], sizes = [2, 32], strides = [1, 1]} : vector<2x64xf32> to vector<2x32xf32>
    %160 = vector.extract_strided_slice %148 {offsets = [0, 64], sizes = [2, 32], strides = [1, 1]} : vector<2x96xf32> to vector<2x32xf32>
    %161 = vector.extract_strided_slice %149 {offsets = [0, 64], sizes = [2, 32], strides = [1, 1]} : vector<2x96xf32> to vector<2x32xf32>
    %162 = arith.addf %161, %15 : vector<2x32xf32>
    %163 = arith.mulf %158, %162 : vector<2x32xf32>
    %164 = arith.addf %160, %163 : vector<2x32xf32>
    %165 = math.tanh %164 : vector<2x32xf32>
    %cst_38 = arith.constant 1.000000e+00 : f32
    %166 = vector.broadcast %cst_38 : f32 to vector<2x32xf32>
    %167 = arith.subf %166, %159 : vector<2x32xf32>
    %168 = arith.mulf %167, %165 : vector<2x32xf32>
    %169 = arith.mulf %159, %122 : vector<2x32xf32>
    %170 = arith.addf %168, %169 : vector<2x32xf32>
    %171 = vector.extract_strided_slice %24 {offsets = [0, 3, 0], sizes = [2, 1, 96], strides = [1, 1, 1]} : vector<2x8x96xf32> to vector<2x1x96xf32>
    %172 = vector.shape_cast %171 : vector<2x1x96xf32> to vector<2x96xf32>
    %cst_39 = arith.constant dense<0.000000e+00> : vector<2x96xf32>
    %173 = tpu.matmul %146, %1, %cst_39 {dimension_numbers = #tpu.dot_dimension_numbers<[1], [0], [0], [1], [0, 0, 1, 1], [], []>} : vector<2x32xf32>, vector<32x96xf32>, vector<2x96xf32> -> vector<2x96xf32>
    %174 = vector.extract_strided_slice %172 {offsets = [0, 0], sizes = [2, 64], strides = [1, 1]} : vector<2x96xf32> to vector<2x64xf32>
    %175 = vector.extract_strided_slice %173 {offsets = [0, 0], sizes = [2, 64], strides = [1, 1]} : vector<2x96xf32> to vector<2x64xf32>
    %176 = arith.addf %174, %175 : vector<2x64xf32>
    %177 = arith.negf %176 : vector<2x64xf32>
    %178 = math.exp %177 : vector<2x64xf32>
    %cst_40 = arith.constant 1.000000e+00 : f32
    %179 = vector.broadcast %cst_40 : f32 to vector<2x64xf32>
    %180 = arith.addf %179, %178 : vector<2x64xf32>
    %181 = arith.divf %179, %180 : vector<2x64xf32>
    %182 = vector.extract_strided_slice %181 {offsets = [0, 0], sizes = [2, 32], strides = [1, 1]} : vector<2x64xf32> to vector<2x32xf32>
    %183 = vector.extract_strided_slice %181 {offsets = [0, 32], sizes = [2, 32], strides = [1, 1]} : vector<2x64xf32> to vector<2x32xf32>
    %184 = vector.extract_strided_slice %172 {offsets = [0, 64], sizes = [2, 32], strides = [1, 1]} : vector<2x96xf32> to vector<2x32xf32>
    %185 = vector.extract_strided_slice %173 {offsets = [0, 64], sizes = [2, 32], strides = [1, 1]} : vector<2x96xf32> to vector<2x32xf32>
    %186 = arith.addf %185, %7 : vector<2x32xf32>
    %187 = arith.mulf %182, %186 : vector<2x32xf32>
    %188 = arith.addf %184, %187 : vector<2x32xf32>
    %189 = math.tanh %188 : vector<2x32xf32>
    %cst_41 = arith.constant 1.000000e+00 : f32
    %190 = vector.broadcast %cst_41 : f32 to vector<2x32xf32>
    %191 = arith.subf %190, %183 : vector<2x32xf32>
    %192 = arith.mulf %191, %189 : vector<2x32xf32>
    %193 = arith.mulf %183, %146 : vector<2x32xf32>
    %194 = arith.addf %192, %193 : vector<2x32xf32>
    %cst_42 = arith.constant dense<0.000000e+00> : vector<2x96xf32>
    %195 = tpu.matmul %194, %8, %cst_42 {dimension_numbers = #tpu.dot_dimension_numbers<[1], [0], [0], [1], [0, 0, 1, 1], [], []>} : vector<2x32xf32>, vector<32x96xf32>, vector<2x96xf32> -> vector<2x96xf32>
    %196 = arith.addf %195, %12 : vector<2x96xf32>
    %cst_43 = arith.constant dense<0.000000e+00> : vector<2x96xf32>
    %197 = tpu.matmul %170, %9, %cst_43 {dimension_numbers = #tpu.dot_dimension_numbers<[1], [0], [0], [1], [0, 0, 1, 1], [], []>} : vector<2x32xf32>, vector<32x96xf32>, vector<2x96xf32> -> vector<2x96xf32>
    %198 = vector.extract_strided_slice %196 {offsets = [0, 0], sizes = [2, 64], strides = [1, 1]} : vector<2x96xf32> to vector<2x64xf32>
    %199 = vector.extract_strided_slice %197 {offsets = [0, 0], sizes = [2, 64], strides = [1, 1]} : vector<2x96xf32> to vector<2x64xf32>
    %200 = arith.addf %198, %199 : vector<2x64xf32>
    %201 = arith.negf %200 : vector<2x64xf32>
    %202 = math.exp %201 : vector<2x64xf32>
    %cst_44 = arith.constant 1.000000e+00 : f32
    %203 = vector.broadcast %cst_44 : f32 to vector<2x64xf32>
    %204 = arith.addf %203, %202 : vector<2x64xf32>
    %205 = arith.divf %203, %204 : vector<2x64xf32>
    %206 = vector.extract_strided_slice %205 {offsets = [0, 0], sizes = [2, 32], strides = [1, 1]} : vector<2x64xf32> to vector<2x32xf32>
    %207 = vector.extract_strided_slice %205 {offsets = [0, 32], sizes = [2, 32], strides = [1, 1]} : vector<2x64xf32> to vector<2x32xf32>
    %208 = vector.extract_strided_slice %196 {offsets = [0, 64], sizes = [2, 32], strides = [1, 1]} : vector<2x96xf32> to vector<2x32xf32>
    %209 = vector.extract_strided_slice %197 {offsets = [0, 64], sizes = [2, 32], strides = [1, 1]} : vector<2x96xf32> to vector<2x32xf32>
    %210 = arith.addf %209, %15 : vector<2x32xf32>
    %211 = arith.mulf %206, %210 : vector<2x32xf32>
    %212 = arith.addf %208, %211 : vector<2x32xf32>
    %213 = math.tanh %212 : vector<2x32xf32>
    %cst_45 = arith.constant 1.000000e+00 : f32
    %214 = vector.broadcast %cst_45 : f32 to vector<2x32xf32>
    %215 = arith.subf %214, %207 : vector<2x32xf32>
    %216 = arith.mulf %215, %213 : vector<2x32xf32>
    %217 = arith.mulf %207, %170 : vector<2x32xf32>
    %218 = arith.addf %216, %217 : vector<2x32xf32>
    %219 = vector.extract_strided_slice %24 {offsets = [0, 4, 0], sizes = [2, 1, 96], strides = [1, 1, 1]} : vector<2x8x96xf32> to vector<2x1x96xf32>
    %220 = vector.shape_cast %219 : vector<2x1x96xf32> to vector<2x96xf32>
    %cst_46 = arith.constant dense<0.000000e+00> : vector<2x96xf32>
    %221 = tpu.matmul %194, %1, %cst_46 {dimension_numbers = #tpu.dot_dimension_numbers<[1], [0], [0], [1], [0, 0, 1, 1], [], []>} : vector<2x32xf32>, vector<32x96xf32>, vector<2x96xf32> -> vector<2x96xf32>
    %222 = vector.extract_strided_slice %220 {offsets = [0, 0], sizes = [2, 64], strides = [1, 1]} : vector<2x96xf32> to vector<2x64xf32>
    %223 = vector.extract_strided_slice %221 {offsets = [0, 0], sizes = [2, 64], strides = [1, 1]} : vector<2x96xf32> to vector<2x64xf32>
    %224 = arith.addf %222, %223 : vector<2x64xf32>
    %225 = arith.negf %224 : vector<2x64xf32>
    %226 = math.exp %225 : vector<2x64xf32>
    %cst_47 = arith.constant 1.000000e+00 : f32
    %227 = vector.broadcast %cst_47 : f32 to vector<2x64xf32>
    %228 = arith.addf %227, %226 : vector<2x64xf32>
    %229 = arith.divf %227, %228 : vector<2x64xf32>
    %230 = vector.extract_strided_slice %229 {offsets = [0, 0], sizes = [2, 32], strides = [1, 1]} : vector<2x64xf32> to vector<2x32xf32>
    %231 = vector.extract_strided_slice %229 {offsets = [0, 32], sizes = [2, 32], strides = [1, 1]} : vector<2x64xf32> to vector<2x32xf32>
    %232 = vector.extract_strided_slice %220 {offsets = [0, 64], sizes = [2, 32], strides = [1, 1]} : vector<2x96xf32> to vector<2x32xf32>
    %233 = vector.extract_strided_slice %221 {offsets = [0, 64], sizes = [2, 32], strides = [1, 1]} : vector<2x96xf32> to vector<2x32xf32>
    %234 = arith.addf %233, %7 : vector<2x32xf32>
    %235 = arith.mulf %230, %234 : vector<2x32xf32>
    %236 = arith.addf %232, %235 : vector<2x32xf32>
    %237 = math.tanh %236 : vector<2x32xf32>
    %cst_48 = arith.constant 1.000000e+00 : f32
    %238 = vector.broadcast %cst_48 : f32 to vector<2x32xf32>
    %239 = arith.subf %238, %231 : vector<2x32xf32>
    %240 = arith.mulf %239, %237 : vector<2x32xf32>
    %241 = arith.mulf %231, %194 : vector<2x32xf32>
    %242 = arith.addf %240, %241 : vector<2x32xf32>
    %cst_49 = arith.constant dense<0.000000e+00> : vector<2x96xf32>
    %243 = tpu.matmul %242, %8, %cst_49 {dimension_numbers = #tpu.dot_dimension_numbers<[1], [0], [0], [1], [0, 0, 1, 1], [], []>} : vector<2x32xf32>, vector<32x96xf32>, vector<2x96xf32> -> vector<2x96xf32>
    %244 = arith.addf %243, %12 : vector<2x96xf32>
    %cst_50 = arith.constant dense<0.000000e+00> : vector<2x96xf32>
    %245 = tpu.matmul %218, %9, %cst_50 {dimension_numbers = #tpu.dot_dimension_numbers<[1], [0], [0], [1], [0, 0, 1, 1], [], []>} : vector<2x32xf32>, vector<32x96xf32>, vector<2x96xf32> -> vector<2x96xf32>
    %246 = vector.extract_strided_slice %244 {offsets = [0, 0], sizes = [2, 64], strides = [1, 1]} : vector<2x96xf32> to vector<2x64xf32>
    %247 = vector.extract_strided_slice %245 {offsets = [0, 0], sizes = [2, 64], strides = [1, 1]} : vector<2x96xf32> to vector<2x64xf32>
    %248 = arith.addf %246, %247 : vector<2x64xf32>
    %249 = arith.negf %248 : vector<2x64xf32>
    %250 = math.exp %249 : vector<2x64xf32>
    %cst_51 = arith.constant 1.000000e+00 : f32
    %251 = vector.broadcast %cst_51 : f32 to vector<2x64xf32>
    %252 = arith.addf %251, %250 : vector<2x64xf32>
    %253 = arith.divf %251, %252 : vector<2x64xf32>
    %254 = vector.extract_strided_slice %253 {offsets = [0, 0], sizes = [2, 32], strides = [1, 1]} : vector<2x64xf32> to vector<2x32xf32>
    %255 = vector.extract_strided_slice %253 {offsets = [0, 32], sizes = [2, 32], strides = [1, 1]} : vector<2x64xf32> to vector<2x32xf32>
    %256 = vector.extract_strided_slice %244 {offsets = [0, 64], sizes = [2, 32], strides = [1, 1]} : vector<2x96xf32> to vector<2x32xf32>
    %257 = vector.extract_strided_slice %245 {offsets = [0, 64], sizes = [2, 32], strides = [1, 1]} : vector<2x96xf32> to vector<2x32xf32>
    %258 = arith.addf %257, %15 : vector<2x32xf32>
    %259 = arith.mulf %254, %258 : vector<2x32xf32>
    %260 = arith.addf %256, %259 : vector<2x32xf32>
    %261 = math.tanh %260 : vector<2x32xf32>
    %cst_52 = arith.constant 1.000000e+00 : f32
    %262 = vector.broadcast %cst_52 : f32 to vector<2x32xf32>
    %263 = arith.subf %262, %255 : vector<2x32xf32>
    %264 = arith.mulf %263, %261 : vector<2x32xf32>
    %265 = arith.mulf %255, %218 : vector<2x32xf32>
    %266 = arith.addf %264, %265 : vector<2x32xf32>
    %267 = vector.extract_strided_slice %24 {offsets = [0, 5, 0], sizes = [2, 1, 96], strides = [1, 1, 1]} : vector<2x8x96xf32> to vector<2x1x96xf32>
    %268 = vector.shape_cast %267 : vector<2x1x96xf32> to vector<2x96xf32>
    %cst_53 = arith.constant dense<0.000000e+00> : vector<2x96xf32>
    %269 = tpu.matmul %242, %1, %cst_53 {dimension_numbers = #tpu.dot_dimension_numbers<[1], [0], [0], [1], [0, 0, 1, 1], [], []>} : vector<2x32xf32>, vector<32x96xf32>, vector<2x96xf32> -> vector<2x96xf32>
    %270 = vector.extract_strided_slice %268 {offsets = [0, 0], sizes = [2, 64], strides = [1, 1]} : vector<2x96xf32> to vector<2x64xf32>
    %271 = vector.extract_strided_slice %269 {offsets = [0, 0], sizes = [2, 64], strides = [1, 1]} : vector<2x96xf32> to vector<2x64xf32>
    %272 = arith.addf %270, %271 : vector<2x64xf32>
    %273 = arith.negf %272 : vector<2x64xf32>
    %274 = math.exp %273 : vector<2x64xf32>
    %cst_54 = arith.constant 1.000000e+00 : f32
    %275 = vector.broadcast %cst_54 : f32 to vector<2x64xf32>
    %276 = arith.addf %275, %274 : vector<2x64xf32>
    %277 = arith.divf %275, %276 : vector<2x64xf32>
    %278 = vector.extract_strided_slice %277 {offsets = [0, 0], sizes = [2, 32], strides = [1, 1]} : vector<2x64xf32> to vector<2x32xf32>
    %279 = vector.extract_strided_slice %277 {offsets = [0, 32], sizes = [2, 32], strides = [1, 1]} : vector<2x64xf32> to vector<2x32xf32>
    %280 = vector.extract_strided_slice %268 {offsets = [0, 64], sizes = [2, 32], strides = [1, 1]} : vector<2x96xf32> to vector<2x32xf32>
    %281 = vector.extract_strided_slice %269 {offsets = [0, 64], sizes = [2, 32], strides = [1, 1]} : vector<2x96xf32> to vector<2x32xf32>
    %282 = arith.addf %281, %7 : vector<2x32xf32>
    %283 = arith.mulf %278, %282 : vector<2x32xf32>
    %284 = arith.addf %280, %283 : vector<2x32xf32>
    %285 = math.tanh %284 : vector<2x32xf32>
    %cst_55 = arith.constant 1.000000e+00 : f32
    %286 = vector.broadcast %cst_55 : f32 to vector<2x32xf32>
    %287 = arith.subf %286, %279 : vector<2x32xf32>
    %288 = arith.mulf %287, %285 : vector<2x32xf32>
    %289 = arith.mulf %279, %242 : vector<2x32xf32>
    %290 = arith.addf %288, %289 : vector<2x32xf32>
    %cst_56 = arith.constant dense<0.000000e+00> : vector<2x96xf32>
    %291 = tpu.matmul %290, %8, %cst_56 {dimension_numbers = #tpu.dot_dimension_numbers<[1], [0], [0], [1], [0, 0, 1, 1], [], []>} : vector<2x32xf32>, vector<32x96xf32>, vector<2x96xf32> -> vector<2x96xf32>
    %292 = arith.addf %291, %12 : vector<2x96xf32>
    %cst_57 = arith.constant dense<0.000000e+00> : vector<2x96xf32>
    %293 = tpu.matmul %266, %9, %cst_57 {dimension_numbers = #tpu.dot_dimension_numbers<[1], [0], [0], [1], [0, 0, 1, 1], [], []>} : vector<2x32xf32>, vector<32x96xf32>, vector<2x96xf32> -> vector<2x96xf32>
    %294 = vector.extract_strided_slice %292 {offsets = [0, 0], sizes = [2, 64], strides = [1, 1]} : vector<2x96xf32> to vector<2x64xf32>
    %295 = vector.extract_strided_slice %293 {offsets = [0, 0], sizes = [2, 64], strides = [1, 1]} : vector<2x96xf32> to vector<2x64xf32>
    %296 = arith.addf %294, %295 : vector<2x64xf32>
    %297 = arith.negf %296 : vector<2x64xf32>
    %298 = math.exp %297 : vector<2x64xf32>
    %cst_58 = arith.constant 1.000000e+00 : f32
    %299 = vector.broadcast %cst_58 : f32 to vector<2x64xf32>
    %300 = arith.addf %299, %298 : vector<2x64xf32>
    %301 = arith.divf %299, %300 : vector<2x64xf32>
    %302 = vector.extract_strided_slice %301 {offsets = [0, 0], sizes = [2, 32], strides = [1, 1]} : vector<2x64xf32> to vector<2x32xf32>
    %303 = vector.extract_strided_slice %301 {offsets = [0, 32], sizes = [2, 32], strides = [1, 1]} : vector<2x64xf32> to vector<2x32xf32>
    %304 = vector.extract_strided_slice %292 {offsets = [0, 64], sizes = [2, 32], strides = [1, 1]} : vector<2x96xf32> to vector<2x32xf32>
    %305 = vector.extract_strided_slice %293 {offsets = [0, 64], sizes = [2, 32], strides = [1, 1]} : vector<2x96xf32> to vector<2x32xf32>
    %306 = arith.addf %305, %15 : vector<2x32xf32>
    %307 = arith.mulf %302, %306 : vector<2x32xf32>
    %308 = arith.addf %304, %307 : vector<2x32xf32>
    %309 = math.tanh %308 : vector<2x32xf32>
    %cst_59 = arith.constant 1.000000e+00 : f32
    %310 = vector.broadcast %cst_59 : f32 to vector<2x32xf32>
    %311 = arith.subf %310, %303 : vector<2x32xf32>
    %312 = arith.mulf %311, %309 : vector<2x32xf32>
    %313 = arith.mulf %303, %266 : vector<2x32xf32>
    %314 = arith.addf %312, %313 : vector<2x32xf32>
    %315 = vector.extract_strided_slice %24 {offsets = [0, 6, 0], sizes = [2, 1, 96], strides = [1, 1, 1]} : vector<2x8x96xf32> to vector<2x1x96xf32>
    %316 = vector.shape_cast %315 : vector<2x1x96xf32> to vector<2x96xf32>
    %cst_60 = arith.constant dense<0.000000e+00> : vector<2x96xf32>
    %317 = tpu.matmul %290, %1, %cst_60 {dimension_numbers = #tpu.dot_dimension_numbers<[1], [0], [0], [1], [0, 0, 1, 1], [], []>} : vector<2x32xf32>, vector<32x96xf32>, vector<2x96xf32> -> vector<2x96xf32>
    %318 = vector.extract_strided_slice %316 {offsets = [0, 0], sizes = [2, 64], strides = [1, 1]} : vector<2x96xf32> to vector<2x64xf32>
    %319 = vector.extract_strided_slice %317 {offsets = [0, 0], sizes = [2, 64], strides = [1, 1]} : vector<2x96xf32> to vector<2x64xf32>
    %320 = arith.addf %318, %319 : vector<2x64xf32>
    %321 = arith.negf %320 : vector<2x64xf32>
    %322 = math.exp %321 : vector<2x64xf32>
    %cst_61 = arith.constant 1.000000e+00 : f32
    %323 = vector.broadcast %cst_61 : f32 to vector<2x64xf32>
    %324 = arith.addf %323, %322 : vector<2x64xf32>
    %325 = arith.divf %323, %324 : vector<2x64xf32>
    %326 = vector.extract_strided_slice %325 {offsets = [0, 0], sizes = [2, 32], strides = [1, 1]} : vector<2x64xf32> to vector<2x32xf32>
    %327 = vector.extract_strided_slice %325 {offsets = [0, 32], sizes = [2, 32], strides = [1, 1]} : vector<2x64xf32> to vector<2x32xf32>
    %328 = vector.extract_strided_slice %316 {offsets = [0, 64], sizes = [2, 32], strides = [1, 1]} : vector<2x96xf32> to vector<2x32xf32>
    %329 = vector.extract_strided_slice %317 {offsets = [0, 64], sizes = [2, 32], strides = [1, 1]} : vector<2x96xf32> to vector<2x32xf32>
    %330 = arith.addf %329, %7 : vector<2x32xf32>
    %331 = arith.mulf %326, %330 : vector<2x32xf32>
    %332 = arith.addf %328, %331 : vector<2x32xf32>
    %333 = math.tanh %332 : vector<2x32xf32>
    %cst_62 = arith.constant 1.000000e+00 : f32
    %334 = vector.broadcast %cst_62 : f32 to vector<2x32xf32>
    %335 = arith.subf %334, %327 : vector<2x32xf32>
    %336 = arith.mulf %335, %333 : vector<2x32xf32>
    %337 = arith.mulf %327, %290 : vector<2x32xf32>
    %338 = arith.addf %336, %337 : vector<2x32xf32>
    %cst_63 = arith.constant dense<0.000000e+00> : vector<2x96xf32>
    %339 = tpu.matmul %338, %8, %cst_63 {dimension_numbers = #tpu.dot_dimension_numbers<[1], [0], [0], [1], [0, 0, 1, 1], [], []>} : vector<2x32xf32>, vector<32x96xf32>, vector<2x96xf32> -> vector<2x96xf32>
    %340 = arith.addf %339, %12 : vector<2x96xf32>
    %cst_64 = arith.constant dense<0.000000e+00> : vector<2x96xf32>
    %341 = tpu.matmul %314, %9, %cst_64 {dimension_numbers = #tpu.dot_dimension_numbers<[1], [0], [0], [1], [0, 0, 1, 1], [], []>} : vector<2x32xf32>, vector<32x96xf32>, vector<2x96xf32> -> vector<2x96xf32>
    %342 = vector.extract_strided_slice %340 {offsets = [0, 0], sizes = [2, 64], strides = [1, 1]} : vector<2x96xf32> to vector<2x64xf32>
    %343 = vector.extract_strided_slice %341 {offsets = [0, 0], sizes = [2, 64], strides = [1, 1]} : vector<2x96xf32> to vector<2x64xf32>
    %344 = arith.addf %342, %343 : vector<2x64xf32>
    %345 = arith.negf %344 : vector<2x64xf32>
    %346 = math.exp %345 : vector<2x64xf32>
    %cst_65 = arith.constant 1.000000e+00 : f32
    %347 = vector.broadcast %cst_65 : f32 to vector<2x64xf32>
    %348 = arith.addf %347, %346 : vector<2x64xf32>
    %349 = arith.divf %347, %348 : vector<2x64xf32>
    %350 = vector.extract_strided_slice %349 {offsets = [0, 0], sizes = [2, 32], strides = [1, 1]} : vector<2x64xf32> to vector<2x32xf32>
    %351 = vector.extract_strided_slice %349 {offsets = [0, 32], sizes = [2, 32], strides = [1, 1]} : vector<2x64xf32> to vector<2x32xf32>
    %352 = vector.extract_strided_slice %340 {offsets = [0, 64], sizes = [2, 32], strides = [1, 1]} : vector<2x96xf32> to vector<2x32xf32>
    %353 = vector.extract_strided_slice %341 {offsets = [0, 64], sizes = [2, 32], strides = [1, 1]} : vector<2x96xf32> to vector<2x32xf32>
    %354 = arith.addf %353, %15 : vector<2x32xf32>
    %355 = arith.mulf %350, %354 : vector<2x32xf32>
    %356 = arith.addf %352, %355 : vector<2x32xf32>
    %357 = math.tanh %356 : vector<2x32xf32>
    %cst_66 = arith.constant 1.000000e+00 : f32
    %358 = vector.broadcast %cst_66 : f32 to vector<2x32xf32>
    %359 = arith.subf %358, %351 : vector<2x32xf32>
    %360 = arith.mulf %359, %357 : vector<2x32xf32>
    %361 = arith.mulf %351, %314 : vector<2x32xf32>
    %362 = arith.addf %360, %361 : vector<2x32xf32>
    %363 = vector.extract_strided_slice %24 {offsets = [0, 7, 0], sizes = [2, 1, 96], strides = [1, 1, 1]} : vector<2x8x96xf32> to vector<2x1x96xf32>
    %364 = vector.shape_cast %363 : vector<2x1x96xf32> to vector<2x96xf32>
    %cst_67 = arith.constant dense<0.000000e+00> : vector<2x96xf32>
    %365 = tpu.matmul %338, %1, %cst_67 {dimension_numbers = #tpu.dot_dimension_numbers<[1], [0], [0], [1], [0, 0, 1, 1], [], []>} : vector<2x32xf32>, vector<32x96xf32>, vector<2x96xf32> -> vector<2x96xf32>
    %366 = vector.extract_strided_slice %364 {offsets = [0, 0], sizes = [2, 64], strides = [1, 1]} : vector<2x96xf32> to vector<2x64xf32>
    %367 = vector.extract_strided_slice %365 {offsets = [0, 0], sizes = [2, 64], strides = [1, 1]} : vector<2x96xf32> to vector<2x64xf32>
    %368 = arith.addf %366, %367 : vector<2x64xf32>
    %369 = arith.negf %368 : vector<2x64xf32>
    %370 = math.exp %369 : vector<2x64xf32>
    %cst_68 = arith.constant 1.000000e+00 : f32
    %371 = vector.broadcast %cst_68 : f32 to vector<2x64xf32>
    %372 = arith.addf %371, %370 : vector<2x64xf32>
    %373 = arith.divf %371, %372 : vector<2x64xf32>
    %374 = vector.extract_strided_slice %373 {offsets = [0, 0], sizes = [2, 32], strides = [1, 1]} : vector<2x64xf32> to vector<2x32xf32>
    %375 = vector.extract_strided_slice %373 {offsets = [0, 32], sizes = [2, 32], strides = [1, 1]} : vector<2x64xf32> to vector<2x32xf32>
    %376 = vector.extract_strided_slice %364 {offsets = [0, 64], sizes = [2, 32], strides = [1, 1]} : vector<2x96xf32> to vector<2x32xf32>
    %377 = vector.extract_strided_slice %365 {offsets = [0, 64], sizes = [2, 32], strides = [1, 1]} : vector<2x96xf32> to vector<2x32xf32>
    %378 = arith.addf %377, %7 : vector<2x32xf32>
    %379 = arith.mulf %374, %378 : vector<2x32xf32>
    %380 = arith.addf %376, %379 : vector<2x32xf32>
    %381 = math.tanh %380 : vector<2x32xf32>
    %cst_69 = arith.constant 1.000000e+00 : f32
    %382 = vector.broadcast %cst_69 : f32 to vector<2x32xf32>
    %383 = arith.subf %382, %375 : vector<2x32xf32>
    %384 = arith.mulf %383, %381 : vector<2x32xf32>
    %385 = arith.mulf %375, %338 : vector<2x32xf32>
    %386 = arith.addf %384, %385 : vector<2x32xf32>
    %cst_70 = arith.constant dense<0.000000e+00> : vector<2x96xf32>
    %387 = tpu.matmul %386, %8, %cst_70 {dimension_numbers = #tpu.dot_dimension_numbers<[1], [0], [0], [1], [0, 0, 1, 1], [], []>} : vector<2x32xf32>, vector<32x96xf32>, vector<2x96xf32> -> vector<2x96xf32>
    %388 = arith.addf %387, %12 : vector<2x96xf32>
    %cst_71 = arith.constant dense<0.000000e+00> : vector<2x96xf32>
    %389 = tpu.matmul %362, %9, %cst_71 {dimension_numbers = #tpu.dot_dimension_numbers<[1], [0], [0], [1], [0, 0, 1, 1], [], []>} : vector<2x32xf32>, vector<32x96xf32>, vector<2x96xf32> -> vector<2x96xf32>
    %390 = vector.extract_strided_slice %388 {offsets = [0, 0], sizes = [2, 64], strides = [1, 1]} : vector<2x96xf32> to vector<2x64xf32>
    %391 = vector.extract_strided_slice %389 {offsets = [0, 0], sizes = [2, 64], strides = [1, 1]} : vector<2x96xf32> to vector<2x64xf32>
    %392 = arith.addf %390, %391 : vector<2x64xf32>
    %393 = arith.negf %392 : vector<2x64xf32>
    %394 = math.exp %393 : vector<2x64xf32>
    %cst_72 = arith.constant 1.000000e+00 : f32
    %395 = vector.broadcast %cst_72 : f32 to vector<2x64xf32>
    %396 = arith.addf %395, %394 : vector<2x64xf32>
    %397 = arith.divf %395, %396 : vector<2x64xf32>
    %398 = vector.extract_strided_slice %397 {offsets = [0, 0], sizes = [2, 32], strides = [1, 1]} : vector<2x64xf32> to vector<2x32xf32>
    %399 = vector.extract_strided_slice %397 {offsets = [0, 32], sizes = [2, 32], strides = [1, 1]} : vector<2x64xf32> to vector<2x32xf32>
    %400 = vector.extract_strided_slice %388 {offsets = [0, 64], sizes = [2, 32], strides = [1, 1]} : vector<2x96xf32> to vector<2x32xf32>
    %401 = vector.extract_strided_slice %389 {offsets = [0, 64], sizes = [2, 32], strides = [1, 1]} : vector<2x96xf32> to vector<2x32xf32>
    %402 = arith.addf %401, %15 : vector<2x32xf32>
    %403 = arith.mulf %398, %402 : vector<2x32xf32>
    %404 = arith.addf %400, %403 : vector<2x32xf32>
    %405 = math.tanh %404 : vector<2x32xf32>
    %cst_73 = arith.constant 1.000000e+00 : f32
    %406 = vector.broadcast %cst_73 : f32 to vector<2x32xf32>
    %407 = arith.subf %406, %399 : vector<2x32xf32>
    %408 = arith.mulf %407, %405 : vector<2x32xf32>
    %409 = arith.mulf %399, %362 : vector<2x32xf32>
    %410 = arith.addf %408, %409 : vector<2x32xf32>
    %c0_74 = arith.constant 0 : index
    %c0_75 = arith.constant 0 : index
    %411 = vector.load %arg9[%c0_74, %c0_75] : memref<32x20xf32, #tpu.memory_space<vmem>>, vector<32x20xf32>
    %c0_76 = arith.constant 0 : index
    %c0_77 = arith.constant 0 : index
    %412 = vector.load %arg10[%c0_76, %c0_77] : memref<1x20xf32, #tpu.memory_space<vmem>>, vector<1x20xf32>
    %c0_78 = arith.constant 0 : index
    %c0_79 = arith.constant 0 : index
    %413 = vector.load %arg11[%c0_78, %c0_79] : memref<20x56xf32, #tpu.memory_space<vmem>>, vector<20x56xf32>
    %c0_80 = arith.constant 0 : index
    %c0_81 = arith.constant 0 : index
    %414 = vector.load %arg12[%c0_80, %c0_81] : memref<1x56xf32, #tpu.memory_space<vmem>>, vector<1x56xf32>
    %cst_82 = arith.constant dense<0.000000e+00> : vector<2x20xf32>
    %415 = tpu.matmul %386, %411, %cst_82 {dimension_numbers = #tpu.dot_dimension_numbers<[1], [0], [0], [1], [0, 0, 1, 1], [], []>} : vector<2x32xf32>, vector<32x20xf32>, vector<2x20xf32> -> vector<2x20xf32>
    %416 = vector.broadcast %412 : vector<1x20xf32> to vector<2x20xf32>
    %417 = arith.addf %415, %416 : vector<2x20xf32>
    %cst_83 = arith.constant 0.000000e+00 : f32
    %418 = vector.broadcast %cst_83 : f32 to vector<2x20xf32>
    %419 = arith.maximumf %417, %418 : vector<2x20xf32>
    %cst_84 = arith.constant dense<0.000000e+00> : vector<2x56xf32>
    %420 = tpu.matmul %419, %413, %cst_84 {dimension_numbers = #tpu.dot_dimension_numbers<[1], [0], [0], [1], [0, 0, 1, 1], [], []>} : vector<2x20xf32>, vector<20x56xf32>, vector<2x56xf32> -> vector<2x56xf32>
    %421 = vector.broadcast %414 : vector<1x56xf32> to vector<2x56xf32>
    %422 = arith.addf %420, %421 : vector<2x56xf32>
    %c0_85 = arith.constant 0 : index
    %c0_86 = arith.constant 0 : index
    %423 = vector.load %arg13[%c0_85, %c0_86] : memref<4x56xf32, #tpu.memory_space<vmem>>, vector<2x56xf32>
    tpu.vector_store %arg13[%c0_85, %c0_86], %422 {strides = array<i32>} : memref<4x56xf32, #tpu.memory_space<vmem>>, vector<2x56xf32>,
    %cst_87 = arith.constant dense<0.000000e+00> : vector<2x20xf32>
    %424 = tpu.matmul %410, %411, %cst_87 {dimension_numbers = #tpu.dot_dimension_numbers<[1], [0], [0], [1], [0, 0, 1, 1], [], []>} : vector<2x32xf32>, vector<32x20xf32>, vector<2x20xf32> -> vector<2x20xf32>
    %425 = vector.broadcast %412 : vector<1x20xf32> to vector<2x20xf32>
    %426 = arith.addf %424, %425 : vector<2x20xf32>
    %cst_88 = arith.constant 0.000000e+00 : f32
    %427 = vector.broadcast %cst_88 : f32 to vector<2x20xf32>
    %428 = arith.maximumf %426, %427 : vector<2x20xf32>
    %cst_89 = arith.constant dense<0.000000e+00> : vector<2x56xf32>
    %429 = tpu.matmul %428, %413, %cst_89 {dimension_numbers = #tpu.dot_dimension_numbers<[1], [0], [0], [1], [0, 0, 1, 1], [], []>} : vector<2x20xf32>, vector<20x56xf32>, vector<2x56xf32> -> vector<2x56xf32>
    %430 = vector.broadcast %414 : vector<1x56xf32> to vector<2x56xf32>
    %431 = arith.addf %429, %430 : vector<2x56xf32>
    %c2 = arith.constant 2 : index
    %c0_90 = arith.constant 0 : index
    %432 = vector.load %arg13[%c2, %c0_90] : memref<4x56xf32, #tpu.memory_space<vmem>>, vector<2x56xf32>
    tpu.vector_store %arg13[%c2, %c0_90], %431 {strides = array<i32>} : memref<4x56xf32, #tpu.memory_space<vmem>>, vector<2x56xf32>,
    return
  }
}

</mosaic_0001>

<bundles_post_ra>
// kernel: gru_predictor_forward.1
= control target key start
LH: loop header
LB: loop body
LE: loop exit
PB: predicated region body
PF: predicated region fallthrough
CT: control target
= control target key end

     0   :  { %18 = vsyncpa [#allocation3], 0  ;;  %s4777_s0 = inlined_call_operand.vmem [shape: f32[2,8], index: 0, kind: input, shape index: {}]   ;;  %s4778_s1 = inlined_call_operand.hbm [shape: f32[1,96], index: 1, kind: input, shape index: {}]   ;;  %s4779_s2 = inlined_call_operand.vmem [shape: f32[32,96], index: 2, kind: input, shape index: {}]   ;;  %s4780_s3 = inlined_call_operand.hbm [shape: f32[1,96], index: 3, kind: input, shape index: {}]   ;;  %s4781_s4 = inlined_call_operand.hbm [shape: f32[1,32], index: 4, kind: input, shape index: {}]   ;;  %s4782_s5 = inlined_call_operand.vmem [shape: f32[32,96], index: 5, kind: input, shape index: {}]   ;;  %s4783_s6 = inlined_call_operand.hbm [shape: f32[32,96], index: 6, kind: input, shape index: {}]   ;;  %s4784_s7 = inlined_call_operand.hbm [shape: f32[1,96], index: 7, kind: input, shape index: {}]   ;;  %s4785_s8 = inlined_call_operand.hbm [shape: f32[1,32], index: 8, kind: input, shape index: {}]   ;;  %s4786_s9 = inlined_call_operand.vmem [shape: f32[32,20], index: 9, kind: input, shape index: {}]   ;;  %s4787_s10 = inlined_call_operand.vmem [shape: f32[1,20], index: 10, kind: input, shape index: {}]   ;;  %s4788_s11 = inlined_call_operand.hbm [shape: f32[20,56], index: 11, kind: input, shape index: {}]   ;;  %s4789_s12 = inlined_call_operand.vmem [shape: f32[1,56], index: 12, kind: input, shape index: {}]   ;;  %s4790_s13 = inlined_call_operand.hbm [shape: f32[4,56], index: 13, kind: output, shape index: {}]  }
   0x1   :  { %19 = vsyncpa [#allocation6], 0 }
   0x2   :  { %20 = vsyncpa [#allocation9], 0 }
   0x3   :  { %21 = vsyncpa [#allocation12], 0 }
   0x4   :  { %22 = vsyncpa [#allocation4], 0  ;;  %s4082_s25 = smov [#allocation5]   ;;  %s4083_s27 = smov [#allocation8]  }
   0x5   :  { %s43_s26 = sshll.u32 %s4082_s25, 4  ;;  %s64_s28 = sshll.u32 %s4083_s27, 4  ;;  %s44_s26 = int_to_ptr.vmem [resolvable:$true] %s43_s26  ;;  %s4168_s28 = int_to_ptr.vmem [resolvable:$true] %s64_s28 }
   0x6   :  { %s3896_s14 = scalar_lea.hbm %s4780_s3, 16 }
   0x7   :  { %p3897_p0 = scmp.ne.s32.totalorder %s4780_s3, %s3896_s14  ;;  %p3900_p1 = scmp.lt.u32.totalorder %s3896_s14, %s4780_s3 }
   0x9   :  { %p3902_p2 = pnand %p3900_p1, %p3897_p0 }
   0xb   :  { %3905 = shalt.err (!%p3902_p2)
}
   0xc   :  { %s3906_s19 = scalar_lea.vmem %s44_s26, 16  ;;  %s3910_s20 = scalar_lea.vmem %s44_s26, 32 }
   0xd   :  { %p3907_p3 = scmp.ne.s32.totalorder %s44_s26, %s3906_s19  ;;  %p3911_p4 = scmp.lt.s32.totalorder %s44_s26, %s44_s26 }
   0xe   :  { %p3912_p5 = scmp.lt.s32.totalorder %s3910_s20, %s3906_s19 }
  0x10   :  { %p3913_p6 = por %p3912_p5, %p3911_p4 }
  0x12   :  { %p3914_p7 = pnand %p3913_p6, %p3907_p3 }
  0x14   :  { %3917 = shalt.err (!%p3914_p7)
}
  0x15   :  { %46 = dma.hbm_to_vmem [thread:$0]  %s4780_s3, 16, %s44_s26, [#allocation6]  }
  0x16   :  { %s3918_s25 = scalar_lea.hbm %s4783_s6, 512 }
  0x17   :  { %p3919_p8 = scmp.ne.s32.totalorder %s4783_s6, %s3918_s25  ;;  %p3922_p9 = scmp.lt.u32.totalorder %s3918_s25, %s4783_s6 }
  0x19   :  { %p3924_p10 = pnand %p3922_p9, %p3919_p8 }
  0x1b   :  { %3927 = shalt.err (!%p3924_p10)
}
  0x1c   :  { %s3928_s15 = scalar_lea.vmem %s4168_s28, 512  ;;  %p3933_p12 = scmp.lt.s32.totalorder %s4168_s28, %s4168_s28 }
  0x1d   :  { %p3929_p11 = scmp.ne.s32.totalorder %s4168_s28, %s3928_s15  ;;  %p3934_p13 = scmp.lt.s32.totalorder %s3928_s15, %s3928_s15 }
  0x1f   :  { %p3935_p0 = por %p3934_p13, %p3933_p12 }
  0x21   :  { %p3936_p1 = pnand %p3935_p0, %p3929_p11 }
  0x23   :  { %3939 = shalt.err (!%p3936_p1)
}
  0x24   :  { %s4084_s3 = smov 128   ;;  %s4085_s26 = smov 8  }
  0x25   :  { %70 = dma.hbm_to_vmem [thread:$0]  %s4783_s6, 512, %s4168_s28, [#allocation9], %s4084_s3, %s4084_s3, %s4085_s26  }
  0x26   :  { %s4086_s18 = smov [#allocation11]   ;;  %s4087_s20 = smov [#allocation2]  }
  0x27   :  { %s87_s19 = sshll.u32 %s4086_s18, 4  ;;  %s31_s21 = sshll.u32 %s4087_s20, 4  ;;  %s88_s19 = int_to_ptr.vmem [resolvable:$true] %s87_s19  ;;  %s32_s21 = int_to_ptr.vmem [resolvable:$true] %s31_s21 }
  0x28   :  { %s3940_s24 = scalar_lea.hbm %s4785_s8, 16 }
  0x29   :  { %p3941_p2 = scmp.ne.s32.totalorder %s4785_s8, %s3940_s24  ;;  %p3944_p3 = scmp.lt.u32.totalorder %s3940_s24, %s4785_s8 }
  0x2b   :  { %p3946_p4 = pnand %p3944_p3, %p3941_p2 }
  0x2d   :  { %3949 = shalt.err (!%p3946_p4)
}
  0x2e   :  { %s3950_s6 = scalar_lea.vmem %s88_s19, 16  ;;  %s3954_s28 = scalar_lea.vmem %s88_s19, 32 }
  0x2f   :  { %p3951_p5 = scmp.ne.s32.totalorder %s88_s19, %s3950_s6  ;;  %p3955_p6 = scmp.lt.s32.totalorder %s88_s19, %s88_s19 }
  0x30   :  { %p3956_p7 = scmp.lt.s32.totalorder %s3954_s28, %s3950_s6 }
  0x32   :  { %p3957_p8 = por %p3956_p7, %p3955_p6 }
  0x34   :  { %p3958_p9 = pnand %p3957_p8, %p3951_p5 }
  0x36   :  { %3961 = shalt.err (!%p3958_p9)
}
  0x37   :  { %90 = dma.hbm_to_vmem [thread:$0]  %s4785_s8, 16, %s88_s19, [#allocation12]  }
  0x38   :  { %s3962_s18 = scalar_lea.hbm %s4778_s1, 16 }
  0x39   :  { %p3963_p10 = scmp.ne.s32.totalorder %s4778_s1, %s3962_s18  ;;  %p3966_p11 = scmp.lt.u32.totalorder %s3962_s18, %s4778_s1 }
  0x3b   :  { %p3968_p12 = pnand %p3966_p11, %p3963_p10 }
  0x3d   :  { %3971 = shalt.err (!%p3968_p12)
}
  0x3e   :  { %s3972_s25 = scalar_lea.vmem %s32_s21, 16  ;;  %s3976_s27 = scalar_lea.vmem %s32_s21, 32 }
  0x3f   :  { %p3973_p13 = scmp.ne.s32.totalorder %s32_s21, %s3972_s25  ;;  %p3977_p0 = scmp.lt.s32.totalorder %s32_s21, %s32_s21 }
  0x40   :  { %p3978_p1 = scmp.lt.s32.totalorder %s3976_s27, %s3972_s25 }
  0x42   :  { %p3979_p2 = por %p3978_p1, %p3977_p0 }
  0x44   :  { %p3980_p3 = pnand %p3979_p2, %p3973_p13 }
  0x46   :  { %3983 = shalt.err (!%p3980_p3)
}
  0x47   :  { %34 = dma.hbm_to_vmem [thread:$0]  %s4778_s1, 16, %s32_s21, [#allocation3]  }
  0x48   :  { %s4088_s29 = smov [#allocation7]   ;;  %s4089_s6 = smov [#allocation10]  }
  0x49   :  { %s53_s30 = sshll.u32 %s4088_s29, 4  ;;  %s77_s28 = sshll.u32 %s4089_s6, 4  ;;  %s54_s30 = int_to_ptr.vmem [resolvable:$true] %s53_s30  ;;  %s78_s28 = int_to_ptr.vmem [resolvable:$true] %s77_s28 }
  0x4a   :  { %s3984_s16 = scalar_lea.hbm %s4781_s4, 16 }
  0x4b   :  { %p3985_p4 = scmp.ne.s32.totalorder %s4781_s4, %s3984_s16  ;;  %p3988_p5 = scmp.lt.u32.totalorder %s3984_s16, %s4781_s4 }
  0x4d   :  { %p3990_p6 = pnand %p3988_p5, %p3985_p4 }
  0x4f   :  { %3993 = shalt.err (!%p3990_p6)
}
  0x50   :  { %s3994_s1 = scalar_lea.vmem %s54_s30, 16  ;;  %s3998_s21 = scalar_lea.vmem %s54_s30, 32 }
  0x51   :  { %p3995_p7 = scmp.ne.s32.totalorder %s54_s30, %s3994_s1  ;;  %p3999_p8 = scmp.lt.s32.totalorder %s54_s30, %s54_s30 }
  0x52   :  { %p4000_p9 = scmp.lt.s32.totalorder %s3998_s21, %s3994_s1 }
  0x54   :  { %p4001_p10 = por %p4000_p9, %p3999_p8 }
  0x56   :  { %p4002_p11 = pnand %p4001_p10, %p3995_p7 }
  0x58   :  { %4005 = shalt.err (!%p4002_p11)
}
  0x59   :  { %56 = dma.hbm_to_vmem [thread:$0]  %s4781_s4, 16, %s54_s30, [#allocation6]  }
  0x5a   :  { %s4006_s8 = scalar_lea.hbm %s4784_s7, 16 }
  0x5b   :  { %p4007_p12 = scmp.ne.s32.totalorder %s4784_s7, %s4006_s8  ;;  %p4010_p13 = scmp.lt.u32.totalorder %s4006_s8, %s4784_s7 }
  0x5d   :  { %p4012_p0 = pnand %p4010_p13, %p4007_p12 }
  0x5f   :  { %4015 = shalt.err (!%p4012_p0)
}
  0x60   :  { %s4016_s15 = scalar_lea.vmem %s78_s28, 16  ;;  %s4020_s16 = scalar_lea.vmem %s78_s28, 32 }
  0x61   :  { %p4017_p1 = scmp.ne.s32.totalorder %s78_s28, %s4016_s15  ;;  %p4021_p2 = scmp.lt.s32.totalorder %s78_s28, %s78_s28 }
  0x62   :  { %p4022_p3 = scmp.lt.s32.totalorder %s4020_s16, %s4016_s15 }
  0x64   :  { %p4023_p4 = por %p4022_p3, %p4021_p2 }
  0x66   :  { %p4024_p5 = pnand %p4023_p4, %p4017_p1 }
  0x68   :  { %4027 = shalt.err (!%p4024_p5)
}
  0x69   :  { %80 = dma.hbm_to_vmem [thread:$0]  %s4784_s7, 16, %s78_s28, [#allocation9]  }
  0x6a   :  { %s4090_s17 = smov [#allocation13]   ;;  %s4028_s1 = scalar_lea.hbm %s4788_s11, 384 }
  0x6b   :  { %s100_s18 = sshll.u32 %s4090_s17, 4  ;;  %p4029_p6 = scmp.ne.s32.totalorder %s4788_s11, %s4028_s1  ;;  %s101_s18 = int_to_ptr.vmem [resolvable:$true] %s100_s18 }
  0x6c   :  { %p4032_p7 = scmp.lt.u32.totalorder %s4028_s1, %s4788_s11 }
  0x6e   :  { %p4034_p8 = pnand %p4032_p7, %p4029_p6 }
  0x70   :  { %4037 = shalt.err (!%p4034_p8)
}
  0x71   :  { %s4038_s27 = scalar_lea.vmem %s101_s18, 384  ;;  %p4043_p10 = scmp.lt.s32.totalorder %s101_s18, %s101_s18 }
  0x72   :  { %p4039_p9 = scmp.ne.s32.totalorder %s101_s18, %s4038_s27  ;;  %p4044_p11 = scmp.lt.s32.totalorder %s4038_s27, %s4038_s27 }
  0x74   :  { %p4045_p12 = por %p4044_p11, %p4043_p10 }
  0x76   :  { %p4046_p13 = pnand %p4045_p12, %p4039_p9 }
  0x78   :  { %4049 = shalt.err (!%p4046_p13)
}
  0x79   :  { %106 = dma.hbm_to_vmem [thread:$0]  %s4788_s11, 384, %s101_s18, [#allocation12], %s4084_s3, %s4084_s3, %s4085_s26  }
  0x7a   :  { %4072 = dma.done.wait [#allocation3], 16  }
  0x7b   :  { %4073 = vsyncadd [#allocation3], 4294967280 }
  0x7c   :  { %4074 = dma.done.wait [#allocation6], 32  }
  0x7d   :  { %4075 = vsyncadd [#allocation6], 4294967264 }
  0x7e   :  { %4076 = dma.done.wait [#allocation9], 528  }
  0x7f   :  { %4077 = vsyncadd [#allocation9], 4294966768 }
  0x80   :  { %4078 = dma.done.wait [#allocation12], 400  }
  0x81   :  { %4079 = vsyncadd [#allocation12], 4294966896  ;;  %v169_v0 = vlaneseq  ;;  %v4091_v1 = vmov 0.0|0.0   ;;  %vm4092_vm0 = vmmov 0   ;;  %v4093_v2 = vmov 0.0   ;;  %v131_v10 = vld [vmem:[%s4779_s2] sm:$0xff] }
  0x82   :  { %3573 = vmatprep.subr.bf16.mxu0 %v4091_v1  ;;  %3277 = vmatprep.mubr.msk.f32.mxu0 %vm4092_vm0, %v4093_v2  ;;  %v4094_v4 = vmov 1966171168   ;;  %v132_v11 = vld [vmem:[%s4779_s2 + $0x8] sm:$0xff]  ;;  %v133_v12 = vld [vmem:[%s4779_s2 + $0x10] sm:$0xff]  ;;  %v134_v14 = vld [vmem:[%s4779_s2 + $0x18] sm:$0xff]  ;;  %s4095_s4 = smov 64  }
  0x83   :  { %v170_v3 = vshrl.u32 %v169_v0, 7  ;;  %v192_v5 = vunpack.c.l.s4 %v4094_v4  ;;  %3579 = vmatprep.subr.bf16.mxu1 %v4091_v1  ;;  %3288 = vmatprep.mubr.msk.f32.mxu1 %vm4092_vm0, %v4093_v2  ;;  %v4280_v13 = vpack.c.bf16 %v132_v11, %v131_v10  ;;  %v3073_v15 = vld [vmem:[#allocation7] ss:$0 sm:$0xff]  ;;  %v168_v16 = vld [vmem:[%s4777_s0] sm:$0x3]  ;;  %v4290_v20 = vpack.c.bf16 %v134_v14, %v133_v12  ;;  %v148_v59 = vld [vmem:[%s4782_s5 + $0x8] sm:$0xff] }
  0x84   :  { %317 = vrot.lane.b32.xlu0 %v3073_v15, %s4095_s4  ;;  %v3072_v18 = vld [vmem:[#allocation5] ss:$0 sm:$0xff]  ;;  %v3076_v33 = vld [vmem:[#allocation2] ss:$0 sm:$0xff]  ;;  %v151_v60 = vld [vmem:[#allocation8] sm:$0xff]  ;;  %s4096_s21 = smov 96  }
  0x85   :  { %v193_v6 = vunpack.c.0.s8 %v192_v5  ;;  %v171_v7 = vsub.s32 0, %v170_v3  ;;  %v178_v8 = vsub.s32 1, %v170_v3  ;;  %3575 = vmatpush3.bf16.msra.mxu0 %v4280_v13  ;;  %v147_v58 = vld [vmem:[%s4782_s5] sm:$0xff]  ;;  %v152_v62 = vld [vmem:[#allocation8 + $0x8] sm:$0xff]  ;;  %v150_v0 = vld [vmem:[%s4782_s5 + $0x18] sm:$0xff]  ;;  %vm362_vm1 = vcmask 1041409  }
  0x86   :  { %3576 = vmatprep.subr.bf16.mxu0 %v4091_v1  ;;  %v4319_v61 = vpack.c.bf16 %v148_v59, %v147_v58  ;;  %v149_v63 = vld [vmem:[%s4782_s5 + $0x10] sm:$0xff]  ;;  %v154_v5 = vld [vmem:[#allocation8 + $0x18] sm:$0xff]  ;;  %vm225_vm2 = vcmask 261120   ;;  %vm2828_vm3 = vcmask 1043456   ;;  %vm2824_vm4 = vcmask 162816  }
  0x87   :  { %v196_v9 = vsub.s32 %v193_v6, %v170_v3  ;;  %v172_v17 = vrot.slane %v168_v16, %v171_v7  ;;  %v179_v19 = vrot.slane %v168_v16, %v178_v8  ;;  %v4327_v3 = vpack.c.bf16 %v152_v62, %v151_v60  ;;  %v153_v4 = vld [vmem:[#allocation8 + $0x10] sm:$0xff] }
  0x88   :  { %3581 = vmatpush3.bf16.msra.mxu1 %v4319_v61  ;;  %vm2902_vm5 = vcmask 451584  }
  0x89   :  { %v197_v21 = vrot.slane %v3072_v18, %v196_v9  ;;  %174 = vbcast.lane.b32.xlu1 %v172_v17, 256  ;;  %181 = vbcast.lane.b32.xlu0 %v179_v19, 256 }
  0x8a   :  { %3578 = vmatpush3.bf16.msra.mxu0 %v4290_v20  ;;  %3582 = vmatprep.subr.bf16.mxu1 %v4091_v1 }
  0x8b   :  { %v198_v22 = vcombine.high %v197_v21, %v197_v21  ;;  %v205_v23 = vrot.slane %v197_v21, %v196_v9  ;;  %3585 = vmatprep.subr.bf16.mxu0 %v4091_v1  ;;  %v3075_v21 = vld [vmem:[#allocation11] ss:$0 sm:$0xff] }
  0x8d   :  { %v212_v24 = vrot.slane %v198_v22, %v196_v9  ;;  %v216_v25 = vrot.slane %v205_v23, %v171_v7  ;;  %3278 = vmatmul.mubr.f32.vlgmr.msra.gmra.mrb[0].mxu0 %v4093_v2  ;;  %v4335_v9 = vpack.c.bf16 %v154_v5, %v153_v4 }
  0x8e   :  { %3299 = vmatprep.mubr.msk.f32.mxu0 %vm4092_vm0, %v4093_v2  ;;  %3587 = vmatpush3.bf16.msra.mxu0 %v4327_v3 }
  0x8f   :  { %v220_v26 = vrot.slane %v212_v24, %v171_v7  ;;  %v4330_v7 = vpack.c.bf16 %v150_v0, %v149_v63  ;;  %3588 = vmatprep.subr.bf16.mxu0 %v4091_v1 }
  0x91   :  { %3584 = vmatpush3.bf16.msra.mxu1 %v4330_v7 }
  0x92   :  { %3591 = vmatprep.subr.bf16.mxu1 %v4091_v1  ;;  %3590 = vmatpush3.bf16.msra.mxu0 %v4335_v9 }
  0x93   :  { %3597 = vmatprep.subr.bf16.mxu0 %v4091_v1 }
  0x95   :  { %3300 = vmatmul.mubr.f32.vlgmr.msra.gmra.mrb[2].mxu0 %v4093_v2 }
  0x96   :  { %3599 = vmatpush3.bf16.msra.mxu0 %v4319_v61  ;;  %3321 = vmatprep.mubr.msk.f32.mxu0 %vm4092_vm0, %v4093_v2 }
  0x97   :  { %3600 = vmatprep.subr.bf16.mxu0 %v4091_v1 }
  0x9a   :  { %3602 = vmatpush3.bf16.msra.mxu0 %v4330_v7 }
  0x9b   :  { %3609 = vmatprep.subr.bf16.mxu0 %v4091_v1 }
  0xf6   :  { %v4298_v27 = vpop.permute.xlu0 %317 }
  0xfb   :  { %v175_v32 = vpop.permute.xlu1 %174  ;;  %v182_v34 = vpop.permute.xlu0 %181 }
  0xfc   :  { %v189_v35 = vmul.f32 %v3076_v33, %v175_v32  ;;  %v190_v36 = vmul.f32 %v3076_v33, %v182_v34 }
  0xfe   :  { %v4303_v37 = vadd.f32 %v216_v25, %v189_v35  ;;  %v4305_v38 = vadd.f32 %v220_v26, %v190_v36 }
 0x160   :  { %v295_v28 = vpop.f32.mrb[0].mxu0 }
 0x161   :  { %v320_v29 = vadd.f32 %v4298_v27, %v295_v28  ;;  %v3279_v30 = vpop.f32.mrb[1].mxu0  ;;  %v300_v39 = vrot.slane %v295_v28, 1  ;;  %v303_v40 = vadd.f32 %v295_v28, %v4303_v37 }
 0x163   :  { %323 = vrot.lane.b32.xlu0 %v320_v29, %s4095_s4  ;;  %v322_v31 = vrot.slane %v320_v29, 1  ;;  %v304_v41 = vadd.f32 %v300_v39, %v4305_v38  ;;  %v3077_v42 = vmul.f32 -1.442695, %v303_v40  ;;  %v4382_v40 = vld [vmem:[#allocation10] ss:$0 sm:$0xff] }
 0x165   :  { %325 = vrot.lane.b32.xlu1 %v322_v31, %s4095_s4  ;;  %v3078_v43 = vmul.f32 -1.442695, %v304_v41  ;;  %3751 = vpow2.f32 %v3077_v42 }
 0x167   :  { %3753 = vpow2.f32 %v3078_v43 }
 0x168   :  { %v504_v26 = vpop.f32.mrb[2].mxu0 }
 0x169   :  { %v3301_v28 = vpop.f32.mrb[3].mxu0 }
 0x16f   :  { %v3752_v44 = vpop.eup %3751 }
 0x170   :  { %v311_v46 = vadd.f32 1.0, %v3752_v44 }
 0x171   :  { %v3754_v45 = vpop.eup %3753 }
 0x172   :  { %v312_v47 = vadd.f32 1.0, %v3754_v45  ;;  %3755 = vrcp.f32 %v311_v46 }
 0x174   :  { %3757 = vrcp.f32 %v312_v47 }
 0x17c   :  { %v3756_v48 = vpop.eup %3755 }
 0x17d   :  { %v343_v11 = vsub.f32 1.0, %v3756_v48  ;;  %v355_v18 = vmul.f32 0.0, %v3756_v48 }
 0x17e   :  { %v3758_v51 = vpop.eup %3757 }
 0x17f   :  { %v344_v12 = vsub.f32 1.0, %v3758_v51  ;;  %v356_v16 = vmul.f32 0.0, %v3758_v51 }
 0x1d5   :  { %v324_v49 = vpop.permute.xlu0 %323 }
 0x1d6   :  { %v329_v50 = vmul.f32 %v3756_v48, %v324_v49 }
 0x1d7   :  { %v326_v52 = vpop.permute.xlu1 %325 }
 0x1d8   :  { %v330_v53 = vmul.f32 %v3758_v51, %v326_v52  ;;  %333 = vrot.lane.b32.xlu0 %v329_v50, %s4095_s4 }
 0x1da   :  { %335 = vrot.lane.b32.xlu1 %v330_v53, %s4095_s4 }
 0x24a   :  { %v334_v54 = vpop.permute.xlu0 %333 }
 0x24b   :  { %v339_v55 = vadd.f32 %v334_v54, %v4303_v37 }
 0x24c   :  { %v336_v56 = vpop.permute.xlu1 %335 }
 0x24d   :  { %3759 = vtanh.f32 %v339_v55  ;;  %v340_v57 = vadd.f32 %v336_v56, %v4305_v38 }
 0x24f   :  { %3761 = vtanh.f32 %v340_v57 }
 0x257   :  { %v3760_v6 = vpop.eup %3759 }
 0x258   :  { %347 = vrot.lane.b32.xlu0 %v3760_v6, %s4096_s21 }
 0x259   :  { %v3762_v8 = vpop.eup %3761 }
 0x25a   :  { %349 = vrot.lane.b32.xlu1 %v3762_v8, %s4096_s21 }
 0x25c   :  { %515 = vrot.lane.b32.xlu0 %v3075_v21, %s4095_s4 }
 0x2ca   :  { %v348_v10 = vpop.permute.xlu0 %347 }
 0x2cb   :  { %v353_v15 = vmul.f32 %v348_v10, %v343_v11 }
 0x2cc   :  { %v350_v14 = vpop.permute.xlu1 %349 }
 0x2cd   :  { %v354_v17 = vmul.f32 %v350_v14, %v344_v12  ;;  %v4353_v22 = vadd.f32 %v355_v18, %v353_v15 }
 0x2ce   :  { %v4376_v34 = vpop.permute.xlu0 %515 }
 0x2cf   :  { %v4350_v19 = vadd.f32 %v356_v16, %v354_v17  ;;  %v518_v36 = vadd.f32 %v4376_v34, %v504_v26  ;;  %v661_v16 = vrot.slane %v4353_v22, 7 }
 0x2d1   :  { %v361_v23 = vrot.slane %v4350_v19, 7 }
 0x2d3   :  { %v363_v24 = vsel %vm362_vm1, %v361_v23, %v4353_v22 }
 0x2d4   :  { %364 = vrot.lane.b32.xlu1 %v363_v24, %s4096_s21 }
 0x346   :  { %v365_v25 = vpop.permute.xlu1 %364 }
 0x347   :  { %3289 = vmatmul.mubr.msk.f32.vlgmr.msra.gmra.mrb[0].mxu1 %vm225_vm2, %v365_v25 }
 0x348   :  { %3593 = vmatpush3.bf16.msra.mxu1 %v4280_v13  ;;  %3310 = vmatprep.mubr.msk.f32.mxu1 %vm4092_vm0, %v4093_v2 }
 0x349   :  { %3594 = vmatprep.subr.bf16.mxu1 %v4091_v1 }
 0x34c   :  { %3596 = vmatpush3.bf16.msra.mxu1 %v4290_v20 }
 0x34d   :  { %3603 = vmatprep.subr.bf16.mxu1 %v4091_v1 }
 0x34f   :  { %3311 = vmatmul.mubr.msk.f32.vlgmr.msra.gmra.mrb[2].mxu1 %vm225_vm2, %v365_v25 }
 0x350   :  { %3605 = vmatpush3.bf16.msra.mxu1 %v4327_v3  ;;  %3332 = vmatprep.mubr.msk.f32.mxu1 %vm4092_vm0, %v4093_v2 }
 0x351   :  { %3606 = vmatprep.subr.bf16.mxu1 %v4091_v1 }
 0x354   :  { %3608 = vmatpush3.bf16.msra.mxu1 %v4335_v9 }
 0x355   :  { %3615 = vmatprep.subr.bf16.mxu1 %v4091_v1 }
 0x41a   :  { %v434_v29 = vpop.f32.mrb[0].mxu1 }
 0x41b   :  { %v3290_v30 = vpop.f32.mrb[1].mxu1  ;;  %v435_v42 = vadd.f32 %v4382_v40, %v434_v29 }
 0x41d   :  { %v508_v45 = vadd.f32 %v504_v26, %v435_v42 }
 0x41f   :  { %v3080_v47 = vmul.f32 -1.442695, %v508_v45 }
 0x422   :  { %v604_v31 = vpop.f32.mrb[2].mxu1 }
 0x423   :  { %v626_v32 = vadd.f32 %v604_v31, %v4298_v27  ;;  %v3312_v33 = vpop.f32.mrb[3].mxu1  ;;  %v609_v39 = vrot.slane %v604_v31, 7  ;;  %v613_v41 = vadd.f32 %v604_v31, %v4305_v38 }
 0x425   :  { %631 = vrot.lane.b32.xlu0 %v626_v32, %s4095_s4  ;;  %v628_v35 = vrot.slane %v626_v32, 7  ;;  %v612_v43 = vadd.f32 %v609_v39, %v4303_v37  ;;  %v3083_v44 = vmul.f32 -1.442695, %v613_v41 }
 0x427   :  { %629 = vrot.lane.b32.xlu1 %v628_v35, %s4095_s4  ;;  %v3082_v46 = vmul.f32 -1.442695, %v612_v43  ;;  %3763 = vpow2.f32 %v3083_v44 }
 0x429   :  { %3765 = vpow2.f32 %v3082_v46 }
 0x42a   :  { %3767 = vpow2.f32 %v3080_v47 }
 0x42b   :  { %520 = vrot.lane.b32.xlu1 %v518_v36, %s4095_s4 }
 0x431   :  { %v3764_v48 = vpop.eup %3763 }
 0x432   :  { %v621_v50 = vadd.f32 1.0, %v3764_v48 }
 0x433   :  { %v3766_v49 = vpop.eup %3765 }
 0x434   :  { %v620_v51 = vadd.f32 1.0, %v3766_v49  ;;  %v3768_v52 = vpop.eup %3767  ;;  %3769 = vrcp.f32 %v621_v50 }
 0x435   :  { %v512_v53 = vadd.f32 1.0, %v3768_v52 }
 0x436   :  { %3771 = vrcp.f32 %v620_v51 }
 0x437   :  { %3773 = vrcp.f32 %v512_v53 }
 0x43e   :  { %v3770_v54 = vpop.eup %3769 }
 0x43f   :  { %v650_v17 = vsub.f32 1.0, %v3770_v54  ;;  %v665_v28 = vmul.f32 %v3770_v54, %v361_v23 }
 0x440   :  { %v3772_v57 = vpop.eup %3771 }
 0x441   :  { %v3774_v60 = vpop.eup %3773  ;;  %v649_v18 = vsub.f32 1.0, %v3772_v57  ;;  %v664_v25 = vmul.f32 %v3772_v57, %v661_v16 }
 0x442   :  { %v530_v30 = vsub.f32 1.0, %v3774_v60  ;;  %v536_v35 = vmul.f32 0.0, %v3774_v60 }
 0x497   :  { %v632_v55 = vpop.permute.xlu0 %631 }
 0x498   :  { %v636_v56 = vmul.f32 %v3770_v54, %v632_v55 }
 0x499   :  { %v630_v58 = vpop.permute.xlu1 %629 }
 0x49a   :  { %v635_v59 = vmul.f32 %v3772_v57, %v630_v58  ;;  %641 = vrot.lane.b32.xlu1 %v636_v56, %s4095_s4 }
 0x49c   :  { %639 = vrot.lane.b32.xlu0 %v635_v59, %s4095_s4 }
 0x49d   :  { %v521_v62 = vpop.permute.xlu1 %520 }
 0x49e   :  { %v523_v63 = vmul.f32 %v3774_v60, %v521_v62 }
 0x4a0   :  { %525 = vrot.lane.b32.xlu0 %v523_v63, %s4095_s4 }
 0x50c   :  { %v642_v0 = vpop.permute.xlu1 %641 }
 0x50d   :  { %v646_v4 = vadd.f32 %v642_v0, %v4305_v38 }
 0x50e   :  { %v640_v5 = vpop.permute.xlu0 %639 }
 0x50f   :  { %3775 = vtanh.f32 %v646_v4  ;;  %v645_v6 = vadd.f32 %v640_v5, %v4303_v37 }
 0x511   :  { %3777 = vtanh.f32 %v645_v6 }
 0x512   :  { %v526_v8 = vpop.permute.xlu0 %525 }
 0x513   :  { %v528_v10 = vadd.f32 %v526_v8, %v435_v42 }
 0x515   :  { %3779 = vtanh.f32 %v528_v10 }
 0x519   :  { %v3776_v11 = vpop.eup %3775 }
 0x51a   :  { %655 = vrot.lane.b32.xlu0 %v3776_v11, %s4096_s21 }
 0x51b   :  { %v3778_v12 = vpop.eup %3777 }
 0x51c   :  { %653 = vrot.lane.b32.xlu1 %v3778_v12, %s4096_s21 }
 0x51f   :  { %v3780_v14 = vpop.eup %3779 }
 0x520   :  { %532 = vrot.lane.b32.xlu1 %v3780_v14, %s4096_s21 }
 0x58c   :  { %v656_v15 = vpop.permute.xlu0 %655 }
 0x58d   :  { %v660_v24 = vmul.f32 %v656_v15, %v650_v17 }
 0x58e   :  { %v654_v21 = vpop.permute.xlu1 %653 }
 0x58f   :  { %v659_v26 = vmul.f32 %v654_v21, %v649_v18  ;;  %v4400_v32 = vadd.f32 %v665_v28, %v660_v24 }
 0x591   :  { %v4398_v29 = vadd.f32 %v664_v25, %v659_v26 }
 0x592   :  { %v533_v31 = vpop.permute.xlu1 %532 }
 0x593   :  { %v670_v33 = vrot.slane %v4398_v29, 1  ;;  %v535_v36 = vmul.f32 %v533_v31, %v530_v30 }
 0x595   :  { %v4403_v22 = vadd.f32 %v536_v35, %v535_v36  ;;  %v671_v39 = vsel %vm362_vm1, %v4400_v32, %v670_v33  ;;  %v974_v35 = vrot.slane %v4400_v32, 7 }
 0x596   :  { %672 = vrot.lane.b32.xlu0 %v671_v39, %s4096_s21  ;;  %v973_v39 = vrot.slane %v4398_v29, 7 }
 0x597   :  { %747 = vrot.lane.b32.xlu1 %v4403_v22, %s4096_s21 }
 0x608   :  { %v673_v19 = vpop.permute.xlu0 %672 }
 0x609   :  { %v748_v23 = vpop.permute.xlu1 %747  ;;  %3322 = vmatmul.mubr.msk.f32.vlgmr.msra.gmra.mrb[4].mxu0 %vm225_vm2, %v673_v19 }
 0x60a   :  { %3611 = vmatpush3.bf16.msra.mxu0 %v4280_v13  ;;  %3333 = vmatmul.mubr.msk.f32.vlgmr.msra.gmra.mrb[4].mxu1 %vm225_vm2, %v748_v23 }
 0x60b   :  { %3612 = vmatprep.subr.bf16.mxu0 %v4091_v1  ;;  %3343 = vmatprep.mubr.msk.f32.mxu0 %vm4092_vm0, %v4093_v2 }
 0x60c   :  { %3617 = vmatpush3.bf16.msra.mxu1 %v4319_v61  ;;  %3354 = vmatprep.mubr.msk.f32.mxu1 %vm4092_vm0, %v4093_v2 }
 0x60d   :  { %3618 = vmatprep.subr.bf16.mxu1 %v4091_v1 }
 0x60e   :  { %3614 = vmatpush3.bf16.msra.mxu0 %v4290_v20 }
 0x60f   :  { %3621 = vmatprep.subr.bf16.mxu0 %v4091_v1 }
 0x610   :  { %3620 = vmatpush3.bf16.msra.mxu1 %v4330_v7 }
 0x611   :  { %3344 = vmatmul.mubr.msk.f32.vlgmr.msra.gmra.mrb[6].mxu0 %vm225_vm2, %v673_v19  ;;  %3627 = vmatprep.subr.bf16.mxu1 %v4091_v1 }
 0x612   :  { %3623 = vmatpush3.bf16.msra.mxu0 %v4327_v3  ;;  %3365 = vmatprep.mubr.msk.f32.mxu0 %vm4092_vm0, %v4093_v2 }
 0x613   :  { %3624 = vmatprep.subr.bf16.mxu0 %v4091_v1 }
 0x616   :  { %3626 = vmatpush3.bf16.msra.mxu0 %v4335_v9 }
 0x617   :  { %3633 = vmatprep.subr.bf16.mxu0 %v4091_v1 }
 0x6dc   :  { %v742_v41 = vpop.f32.mrb[4].mxu0 }
 0x6dd   :  { %v3323_v42 = vpop.f32.mrb[5].mxu0  ;;  %v817_v43 = vpop.f32.mrb[4].mxu1  ;;  %v743_v54 = vadd.f32 %v4382_v40, %v742_v41 }
 0x6de   :  { %v3334_v44 = vpop.f32.mrb[5].mxu1  ;;  %v828_v50 = vadd.f32 %v817_v43, %v4376_v34 }
 0x6df   :  { %v821_v57 = vadd.f32 %v817_v43, %v743_v54 }
 0x6e1   :  { %v3086_v59 = vmul.f32 -1.442695, %v821_v57 }
 0x6e4   :  { %v914_v45 = vpop.f32.mrb[6].mxu0 }
 0x6e5   :  { %v937_v46 = vadd.f32 %v914_v45, %v4298_v27  ;;  %v3345_v47 = vpop.f32.mrb[7].mxu0  ;;  %v919_v51 = vrot.slane %v914_v45, 6  ;;  %v920_v52 = vrot.slane %v914_v45, 7 }
 0x6e7   :  { %v940_v48 = vrot.slane %v937_v46, 7  ;;  %v939_v49 = vrot.slane %v937_v46, 6  ;;  %v923_v53 = vadd.f32 %v919_v51, %v4303_v37  ;;  %v924_v55 = vadd.f32 %v920_v52, %v4305_v38 }
 0x6e9   :  { %943 = vrot.lane.b32.xlu1 %v940_v48, %s4095_s4  ;;  %941 = vrot.lane.b32.xlu0 %v939_v49, %s4095_s4  ;;  %v3088_v56 = vmul.f32 -1.442695, %v923_v53  ;;  %v3089_v58 = vmul.f32 -1.442695, %v924_v55 }
 0x6eb   :  { %3781 = vpow2.f32 %v3088_v56 }
 0x6ec   :  { %3783 = vpow2.f32 %v3089_v58 }
 0x6ed   :  { %830 = vrot.lane.b32.xlu0 %v828_v50, %s4095_s4  ;;  %3785 = vpow2.f32 %v3086_v59 }
 0x6f5   :  { %v3782_v60 = vpop.eup %3781 }
 0x6f6   :  { %v3784_v62 = vpop.eup %3783  ;;  %v931_v63 = vadd.f32 1.0, %v3782_v60 }
 0x6f7   :  { %v932_v0 = vadd.f32 1.0, %v3784_v62  ;;  %v3786_v4 = vpop.eup %3785 }
 0x6f8   :  { %3787 = vrcp.f32 %v931_v63  ;;  %v825_v5 = vadd.f32 1.0, %v3786_v4 }
 0x6f9   :  { %3789 = vrcp.f32 %v932_v0 }
 0x6fa   :  { %3791 = vrcp.f32 %v825_v5 }
 0x702   :  { %v3788_v6 = vpop.eup %3787 }
 0x703   :  { %v3790_v8 = vpop.eup %3789  ;;  %v961_v19 = vsub.f32 1.0, %v3788_v6  ;;  %v977_v44 = vmul.f32 %v3788_v6, %v973_v39 }
 0x704   :  { %v3792_v15 = vpop.eup %3791  ;;  %v962_v36 = vsub.f32 1.0, %v3790_v8  ;;  %v978_v42 = vmul.f32 %v3790_v8, %v974_v35 }
 0x705   :  { %v840_v48 = vsub.f32 1.0, %v3792_v15  ;;  %v846_v51 = vmul.f32 %v3792_v15, %v4403_v22 }
 0x75b   :  { %v944_v10 = vpop.permute.xlu1 %943  ;;  %v942_v11 = vpop.permute.xlu0 %941 }
 0x75c   :  { %v948_v12 = vmul.f32 %v3790_v8, %v944_v10  ;;  %v947_v14 = vmul.f32 %v3788_v6, %v942_v11 }
 0x75e   :  { %953 = vrot.lane.b32.xlu0 %v948_v12, %s4095_s4  ;;  %951 = vrot.lane.b32.xlu1 %v947_v14, %s4095_s4 }
 0x75f   :  { %v831_v16 = vpop.permute.xlu0 %830 }
 0x760   :  { %v833_v17 = vmul.f32 %v3792_v15, %v831_v16 }
 0x762   :  { %835 = vrot.lane.b32.xlu1 %v833_v17, %s4095_s4 }
 0x7d0   :  { %v954_v18 = vpop.permute.xlu0 %953  ;;  %v952_v21 = vpop.permute.xlu1 %951 }
 0x7d1   :  { %v958_v24 = vadd.f32 %v954_v18, %v4305_v38  ;;  %v957_v25 = vadd.f32 %v952_v21, %v4303_v37 }
 0x7d3   :  { %3793 = vtanh.f32 %v958_v24 }
 0x7d4   :  { %3795 = vtanh.f32 %v957_v25  ;;  %v836_v26 = vpop.permute.xlu1 %835 }
 0x7d5   :  { %v838_v28 = vadd.f32 %v836_v26, %v743_v54 }
 0x7d7   :  { %3797 = vtanh.f32 %v838_v28 }
 0x7dd   :  { %v3794_v30 = vpop.eup %3793 }
 0x7de   :  { %v3796_v31 = vpop.eup %3795  ;;  %967 = vrot.lane.b32.xlu1 %v3794_v30, %s4096_s21 }
 0x7df   :  { %965 = vrot.lane.b32.xlu0 %v3796_v31, %s4096_s21 }
 0x7e1   :  { %v3798_v33 = vpop.eup %3797 }
 0x7e3   :  { %842 = vrot.lane.b32.xlu0 %v3798_v33, %s4096_s21 }
 0x850   :  { %v968_v23 = vpop.permute.xlu1 %967 }
 0x851   :  { %v966_v41 = vpop.permute.xlu0 %965  ;;  %v972_v43 = vmul.f32 %v968_v23, %v962_v36 }
 0x852   :  { %v971_v45 = vmul.f32 %v966_v41, %v961_v19 }
 0x853   :  { %v4449_v46 = vadd.f32 %v978_v42, %v972_v43 }
 0x854   :  { %v4451_v47 = vadd.f32 %v977_v44, %v971_v45 }
 0x855   :  { %v984_v49 = vrot.slane %v4449_v46, 1  ;;  %v843_v50 = vpop.permute.xlu0 %842 }
 0x856   :  { %v983_v32 = vrot.slane %v4451_v47, 2  ;;  %v845_v29 = vmul.f32 %v843_v50, %v840_v48 }
 0x858   :  { %v4456_v52 = vadd.f32 %v846_v51, %v845_v29  ;;  %v985_v53 = vsel %vm362_vm1, %v984_v49, %v983_v32  ;;  %v1287_v51 = vrot.slane %v4451_v47, 7 }
 0x859   :  { %986 = vrot.lane.b32.xlu1 %v985_v53, %s4096_s21  ;;  %v1288_v53 = vrot.slane %v4449_v46, 7 }
 0x85a   :  { %1061 = vrot.lane.b32.xlu0 %v4456_v52, %s4096_s21 }
 0x8cb   :  { %v987_v54 = vpop.permute.xlu1 %986 }
 0x8cc   :  { %v1062_v55 = vpop.permute.xlu0 %1061  ;;  %3355 = vmatmul.mubr.msk.f32.vlgmr.msra.gmra.mrb[6].mxu1 %vm225_vm2, %v987_v54 }
 0x8cd   :  { %3629 = vmatpush3.bf16.msra.mxu1 %v4280_v13  ;;  %3366 = vmatmul.mubr.msk.f32.vlgmr.msra.gmra.mrb[8].mxu0 %vm225_vm2, %v1062_v55 }
 0x8ce   :  { %3630 = vmatprep.subr.bf16.mxu1 %v4091_v1  ;;  %3376 = vmatprep.mubr.msk.f32.mxu1 %vm4092_vm0, %v4093_v2 }
 0x8cf   :  { %3635 = vmatpush3.bf16.msra.mxu0 %v4319_v61  ;;  %3387 = vmatprep.mubr.msk.f32.mxu0 %vm4092_vm0, %v4093_v2 }
 0x8d0   :  { %3636 = vmatprep.subr.bf16.mxu0 %v4091_v1 }
 0x8d1   :  { %3632 = vmatpush3.bf16.msra.mxu1 %v4290_v20 }
 0x8d2   :  { %3639 = vmatprep.subr.bf16.mxu1 %v4091_v1 }
 0x8d3   :  { %3638 = vmatpush3.bf16.msra.mxu0 %v4330_v7 }
 0x8d4   :  { %3377 = vmatmul.mubr.msk.f32.vlgmr.msra.gmra.mrb[8].mxu1 %vm225_vm2, %v987_v54  ;;  %3645 = vmatprep.subr.bf16.mxu0 %v4091_v1 }
 0x8d5   :  { %3641 = vmatpush3.bf16.msra.mxu1 %v4327_v3  ;;  %3398 = vmatprep.mubr.msk.f32.mxu1 %vm4092_vm0, %v4093_v2 }
 0x8d6   :  { %3642 = vmatprep.subr.bf16.mxu1 %v4091_v1 }
 0x8d9   :  { %3644 = vmatpush3.bf16.msra.mxu1 %v4335_v9 }
 0x8da   :  { %3651 = vmatprep.subr.bf16.mxu1 %v4091_v1 }
 0x99f   :  { %v1056_v22 = vpop.f32.mrb[6].mxu1 }
 0x9a0   :  { %v3356_v56 = vpop.f32.mrb[7].mxu1  ;;  %v1131_v57 = vpop.f32.mrb[8].mxu0  ;;  %v1057_v10 = vadd.f32 %v4382_v40, %v1056_v22 }
 0x9a1   :  { %v3367_v58 = vpop.f32.mrb[9].mxu0  ;;  %v1142_v4 = vadd.f32 %v1131_v57, %v4376_v34 }
 0x9a2   :  { %v1135_v14 = vadd.f32 %v1131_v57, %v1057_v10 }
 0x9a4   :  { %v3092_v16 = vmul.f32 -1.442695, %v1135_v14 }
 0x9a7   :  { %v1228_v59 = vpop.f32.mrb[8].mxu1 }
 0x9a8   :  { %v1251_v60 = vadd.f32 %v1228_v59, %v4298_v27  ;;  %v3378_v62 = vpop.f32.mrb[9].mxu1  ;;  %v1233_v5 = vrot.slane %v1228_v59, 5  ;;  %v1234_v6 = vrot.slane %v1228_v59, 6 }
 0x9aa   :  { %v1254_v63 = vrot.slane %v1251_v60, 6  ;;  %v1253_v0 = vrot.slane %v1251_v60, 5  ;;  %v1237_v8 = vadd.f32 %v1233_v5, %v4303_v37  ;;  %v1238_v11 = vadd.f32 %v1234_v6, %v4305_v38 }
 0x9ac   :  { %1257 = vrot.lane.b32.xlu0 %v1254_v63, %s4095_s4  ;;  %1255 = vrot.lane.b32.xlu1 %v1253_v0, %s4095_s4  ;;  %v3094_v12 = vmul.f32 -1.442695, %v1237_v8  ;;  %v3095_v15 = vmul.f32 -1.442695, %v1238_v11 }
 0x9ae   :  { %3799 = vpow2.f32 %v3094_v12 }
 0x9af   :  { %3801 = vpow2.f32 %v3095_v15 }
 0x9b0   :  { %1144 = vrot.lane.b32.xlu1 %v1142_v4, %s4095_s4  ;;  %3803 = vpow2.f32 %v3092_v16 }
 0x9b8   :  { %v3800_v17 = vpop.eup %3799 }
 0x9b9   :  { %v3802_v18 = vpop.eup %3801  ;;  %v1245_v21 = vadd.f32 1.0, %v3800_v17 }
 0x9ba   :  { %v1246_v24 = vadd.f32 1.0, %v3802_v18  ;;  %v3804_v25 = vpop.eup %3803 }
 0x9bb   :  { %3805 = vrcp.f32 %v1245_v21  ;;  %v1139_v26 = vadd.f32 1.0, %v3804_v25 }
 0x9bc   :  { %3807 = vrcp.f32 %v1246_v24 }
 0x9bd   :  { %3809 = vrcp.f32 %v1139_v26 }
 0x9c5   :  { %v3806_v28 = vpop.eup %3805 }
 0x9c6   :  { %v3808_v30 = vpop.eup %3807  ;;  %v1275_v29 = vsub.f32 1.0, %v3806_v28  ;;  %v1291_v22 = vmul.f32 %v3806_v28, %v1287_v51 }
 0x9c7   :  { %v3810_v39 = vpop.eup %3809  ;;  %v1276_v55 = vsub.f32 1.0, %v3808_v30  ;;  %v1292_v58 = vmul.f32 %v3808_v30, %v1288_v53 }
 0x9c8   :  { %v1154_v62 = vsub.f32 1.0, %v3810_v39  ;;  %v1160_v47 = vmul.f32 %v3810_v39, %v4456_v52 }
 0xa1e   :  { %v1258_v31 = vpop.permute.xlu0 %1257  ;;  %v1256_v33 = vpop.permute.xlu1 %1255 }
 0xa1f   :  { %v1262_v35 = vmul.f32 %v3808_v30, %v1258_v31  ;;  %v1261_v36 = vmul.f32 %v3806_v28, %v1256_v33 }
 0xa21   :  { %1265 = vrot.lane.b32.xlu0 %v1261_v36, %s4095_s4  ;;  %1267 = vrot.lane.b32.xlu1 %v1262_v35, %s4095_s4 }
 0xa22   :  { %v1145_v19 = vpop.permute.xlu1 %1144 }
 0xa23   :  { %v1147_v23 = vmul.f32 %v3810_v39, %v1145_v19 }
 0xa25   :  { %1149 = vrot.lane.b32.xlu0 %v1147_v23, %s4095_s4 }
 0xa93   :  { %v1266_v41 = vpop.permute.xlu0 %1265  ;;  %v1268_v42 = vpop.permute.xlu1 %1267 }
 0xa94   :  { %v1271_v43 = vadd.f32 %v1266_v41, %v4303_v37  ;;  %v1272_v44 = vadd.f32 %v1268_v42, %v4305_v38 }
 0xa96   :  { %3811 = vtanh.f32 %v1271_v43 }
 0xa97   :  { %3813 = vtanh.f32 %v1272_v44  ;;  %v1150_v45 = vpop.permute.xlu0 %1149 }
 0xa98   :  { %v1152_v48 = vadd.f32 %v1150_v45, %v1057_v10 }
 0xa9a   :  { %3815 = vtanh.f32 %v1152_v48 }
 0xaa0   :  { %v3812_v49 = vpop.eup %3811 }
 0xaa1   :  { %v3814_v50 = vpop.eup %3813  ;;  %1279 = vrot.lane.b32.xlu1 %v3812_v49, %s4096_s21 }
 0xaa2   :  { %1281 = vrot.lane.b32.xlu0 %v3814_v50, %s4096_s21 }
 0xaa4   :  { %v3816_v32 = vpop.eup %3815 }
 0xaa5   :  { %1156 = vrot.lane.b32.xlu1 %v3816_v32, %s4096_s21 }
 0xb13   :  { %v1280_v54 = vpop.permute.xlu1 %1279 }
 0xb14   :  { %v1285_v56 = vmul.f32 %v1280_v54, %v1275_v29  ;;  %v1282_v57 = vpop.permute.xlu0 %1281 }
 0xb15   :  { %v1286_v59 = vmul.f32 %v1282_v57, %v1276_v55 }
 0xb16   :  { %v4501_v60 = vadd.f32 %v1291_v22, %v1285_v56 }
 0xb17   :  { %v4503_v63 = vadd.f32 %v1292_v58, %v1286_v59  ;;  %v1157_v0 = vpop.permute.xlu1 %1156 }
 0xb18   :  { %v1297_v4 = vrot.slane %v4501_v60, 3  ;;  %v1159_v5 = vmul.f32 %v1157_v0, %v1154_v62 }
 0xb19   :  { %v1298_v46 = vrot.slane %v4503_v63, 2 }
 0xb1a   :  { %v4508_v6 = vadd.f32 %v1160_v47, %v1159_v5  ;;  %v1602_v5 = vrot.slane %v4503_v63, 7 }
 0xb1b   :  { %v1299_v8 = vsel %vm362_vm1, %v1298_v46, %v1297_v4 }
 0xb1c   :  { %1300 = vrot.lane.b32.xlu0 %v1299_v8, %s4096_s21  ;;  %1375 = vrot.lane.b32.xlu1 %v4508_v6, %s4096_s21  ;;  %v1601_v8 = vrot.slane %v4501_v60, 7 }
 0xb8e   :  { %v1301_v10 = vpop.permute.xlu0 %1300  ;;  %v1376_v11 = vpop.permute.xlu1 %1375 }
 0xb8f   :  { %3388 = vmatmul.mubr.msk.f32.vlgmr.msra.gmra.mrb[10].mxu0 %vm225_vm2, %v1301_v10  ;;  %3399 = vmatmul.mubr.msk.f32.vlgmr.msra.gmra.mrb[10].mxu1 %vm225_vm2, %v1376_v11 }
 0xb90   :  { %3647 = vmatpush3.bf16.msra.mxu0 %v4280_v13  ;;  %3409 = vmatprep.mubr.msk.f32.mxu0 %vm4092_vm0, %v4093_v2 }
 0xb91   :  { %3648 = vmatprep.subr.bf16.mxu0 %v4091_v1  ;;  %3653 = vmatpush3.bf16.msra.mxu1 %v4319_v61 }
 0xb92   :  { %3654 = vmatprep.subr.bf16.mxu1 %v4091_v1  ;;  %3420 = vmatprep.mubr.msk.f32.mxu1 %vm4092_vm0, %v4093_v2 }
 0xb94   :  { %3650 = vmatpush3.bf16.msra.mxu0 %v4290_v20 }
 0xb95   :  { %3657 = vmatprep.subr.bf16.mxu0 %v4091_v1  ;;  %3656 = vmatpush3.bf16.msra.mxu1 %v4330_v7 }
 0xb96   :  { %3663 = vmatprep.subr.bf16.mxu1 %v4091_v1 }
 0xb97   :  { %3410 = vmatmul.mubr.msk.f32.vlgmr.msra.gmra.mrb[12].mxu0 %vm225_vm2, %v1301_v10 }
 0xb98   :  { %3659 = vmatpush3.bf16.msra.mxu0 %v4327_v3  ;;  %3431 = vmatprep.mubr.msk.f32.mxu0 %vm4092_vm0, %v4093_v2 }
 0xb99   :  { %3660 = vmatprep.subr.bf16.mxu0 %v4091_v1 }
 0xb9c   :  { %3662 = vmatpush3.bf16.msra.mxu0 %v4335_v9 }
 0xb9d   :  { %3669 = vmatprep.subr.bf16.mxu0 %v4091_v1 }
 0xc62   :  { %v1370_v52 = vpop.f32.mrb[10].mxu0  ;;  %v1445_v12 = vpop.f32.mrb[10].mxu1 }
 0xc63   :  { %v3389_v14 = vpop.f32.mrb[11].mxu0  ;;  %v3400_v15 = vpop.f32.mrb[11].mxu1  ;;  %v1456_v25 = vadd.f32 %v1445_v12, %v4376_v34  ;;  %v1371_v31 = vadd.f32 %v4382_v40, %v1370_v52 }
 0xc65   :  { %v1449_v36 = vadd.f32 %v1445_v12, %v1371_v31 }
 0xc67   :  { %v3098_v19 = vmul.f32 -1.442695, %v1449_v36 }
 0xc6a   :  { %v1542_v16 = vpop.f32.mrb[12].mxu0 }
 0xc6b   :  { %v1565_v17 = vadd.f32 %v1542_v16, %v4298_v27  ;;  %v3411_v18 = vpop.f32.mrb[13].mxu0  ;;  %v1547_v26 = vrot.slane %v1542_v16, 4  ;;  %v1548_v28 = vrot.slane %v1542_v16, 5 }
 0xc6d   :  { %v1568_v21 = vrot.slane %v1565_v17, 5  ;;  %v1567_v24 = vrot.slane %v1565_v17, 4  ;;  %v1551_v30 = vadd.f32 %v1547_v26, %v4303_v37  ;;  %v1552_v33 = vadd.f32 %v1548_v28, %v4305_v38 }
 0xc6f   :  { %1571 = vrot.lane.b32.xlu1 %v1568_v21, %s4095_s4  ;;  %1569 = vrot.lane.b32.xlu0 %v1567_v24, %s4095_s4  ;;  %v3100_v35 = vmul.f32 -1.442695, %v1551_v30  ;;  %v3101_v39 = vmul.f32 -1.442695, %v1552_v33 }
 0xc71   :  { %3817 = vpow2.f32 %v3100_v35 }
 0xc72   :  { %3819 = vpow2.f32 %v3101_v39 }
 0xc73   :  { %1458 = vrot.lane.b32.xlu0 %v1456_v25, %s4095_s4  ;;  %3821 = vpow2.f32 %v3098_v19 }
 0xc7b   :  { %v3818_v23 = vpop.eup %3817 }
 0xc7c   :  { %v3820_v41 = vpop.eup %3819  ;;  %v1559_v42 = vadd.f32 1.0, %v3818_v23 }
 0xc7d   :  { %v1560_v43 = vadd.f32 1.0, %v3820_v41  ;;  %v3822_v44 = vpop.eup %3821 }
 0xc7e   :  { %3823 = vrcp.f32 %v1559_v42  ;;  %v1453_v45 = vadd.f32 1.0, %v3822_v44 }
 0xc7f   :  { %3825 = vrcp.f32 %v1560_v43 }
 0xc80   :  { %3827 = vrcp.f32 %v1453_v45 }
 0xc88   :  { %v3824_v48 = vpop.eup %3823 }
 0xc89   :  { %v3826_v49 = vpop.eup %3825  ;;  %v1589_v10 = vsub.f32 1.0, %v3824_v48  ;;  %v1605_v15 = vmul.f32 %v3824_v48, %v1601_v8 }
 0xc8a   :  { %v3828_v53 = vpop.eup %3827  ;;  %v1590_v46 = vsub.f32 1.0, %v3826_v49  ;;  %v1606_v12 = vmul.f32 %v3826_v49, %v1602_v5 }
 0xc8b   :  { %v1468_v21 = vsub.f32 1.0, %v3828_v53  ;;  %v1474_v26 = vmul.f32 %v3828_v53, %v4508_v6 }
 0xce1   :  { %v1572_v50 = vpop.permute.xlu1 %1571  ;;  %v1570_v32 = vpop.permute.xlu0 %1569 }
 0xce2   :  { %v1576_v51 = vmul.f32 %v3826_v49, %v1572_v50  ;;  %v1575_v29 = vmul.f32 %v3824_v48, %v1570_v32 }
 0xce4   :  { %1581 = vrot.lane.b32.xlu0 %v1576_v51, %s4095_s4  ;;  %1579 = vrot.lane.b32.xlu1 %v1575_v29, %s4095_s4 }
 0xce5   :  { %v1459_v54 = vpop.permute.xlu0 %1458 }
 0xce6   :  { %v1461_v55 = vmul.f32 %v3828_v53, %v1459_v54 }
 0xce8   :  { %1463 = vrot.lane.b32.xlu1 %v1461_v55, %s4095_s4 }
 0xd56   :  { %v1582_v22 = vpop.permute.xlu0 %1581  ;;  %v1580_v56 = vpop.permute.xlu1 %1579 }
 0xd57   :  { %v1586_v57 = vadd.f32 %v1582_v22, %v4305_v38  ;;  %v1585_v58 = vadd.f32 %v1580_v56, %v4303_v37 }
 0xd59   :  { %3829 = vtanh.f32 %v1586_v57 }
 0xd5a   :  { %3831 = vtanh.f32 %v1585_v58  ;;  %v1464_v59 = vpop.permute.xlu1 %1463 }
 0xd5b   :  { %v1466_v62 = vadd.f32 %v1464_v59, %v1371_v31 }
 0xd5d   :  { %3833 = vtanh.f32 %v1466_v62 }
 0xd63   :  { %v3830_v0 = vpop.eup %3829 }
 0xd64   :  { %v3832_v4 = vpop.eup %3831  ;;  %1595 = vrot.lane.b32.xlu1 %v3830_v0, %s4096_s21 }
 0xd65   :  { %1593 = vrot.lane.b32.xlu0 %v3832_v4, %s4096_s21 }
 0xd67   :  { %v3834_v47 = vpop.eup %3833 }
 0xd69   :  { %1470 = vrot.lane.b32.xlu0 %v3834_v47, %s4096_s21 }
 0xdd6   :  { %v1596_v11 = vpop.permute.xlu1 %1595 }
 0xdd7   :  { %v1594_v52 = vpop.permute.xlu0 %1593  ;;  %v1600_v14 = vmul.f32 %v1596_v11, %v1590_v46 }
 0xdd8   :  { %v1599_v16 = vmul.f32 %v1594_v52, %v1589_v10 }
 0xdd9   :  { %v4553_v17 = vadd.f32 %v1606_v12, %v1600_v14 }
 0xdda   :  { %v4555_v18 = vadd.f32 %v1605_v15, %v1599_v16 }
 0xddb   :  { %v1612_v24 = vrot.slane %v4553_v17, 3  ;;  %v1471_v25 = vpop.permute.xlu0 %1470 }
 0xddc   :  { %v1611_v63 = vrot.slane %v4555_v18, 4  ;;  %v1473_v60 = vmul.f32 %v1471_v25, %v1468_v21 }
 0xdde   :  { %v4560_v28 = vadd.f32 %v1474_v26, %v1473_v60  ;;  %v1613_v30 = vsel %vm362_vm1, %v1612_v24, %v1611_v63 }
 0xddf   :  { %1614 = vrot.lane.b32.xlu1 %v1613_v30, %s4096_s21 }
 0xde0   :  { %1689 = vrot.lane.b32.xlu0 %v4560_v28, %s4096_s21 }
 0xe51   :  { %v1615_v31 = vpop.permute.xlu1 %1614 }
 0xe52   :  { %v1690_v33 = vpop.permute.xlu0 %1689  ;;  %3421 = vmatmul.mubr.msk.f32.vlgmr.msra.gmra.mrb[12].mxu1 %vm225_vm2, %v1615_v31 }
 0xe53   :  { %3665 = vmatpush3.bf16.msra.mxu1 %v4280_v13  ;;  %3432 = vmatmul.mubr.msk.f32.vlgmr.msra.gmra.mrb[14].mxu0 %vm225_vm2, %v1690_v33  ;;  %v1915_v33 = vrot.slane %v4555_v18, 7 }
 0xe54   :  { %3666 = vmatprep.subr.bf16.mxu1 %v4091_v1  ;;  %3442 = vmatprep.mubr.msk.f32.mxu1 %vm4092_vm0, %v4093_v2 }
 0xe55   :  { %3671 = vmatpush3.bf16.msra.mxu0 %v4319_v61  ;;  %3453 = vmatprep.mubr.msk.f32.mxu0 %vm4092_vm0, %v4093_v2 }
 0xe56   :  { %3672 = vmatprep.subr.bf16.mxu0 %v4091_v1 }
 0xe57   :  { %3668 = vmatpush3.bf16.msra.mxu1 %v4290_v20 }
 0xe58   :  { %3675 = vmatprep.subr.bf16.mxu1 %v4091_v1 }
 0xe59   :  { %3674 = vmatpush3.bf16.msra.mxu0 %v4330_v7 }
 0xe5a   :  { %3443 = vmatmul.mubr.msk.f32.vlgmr.msra.gmra.mrb[14].mxu1 %vm225_vm2, %v1615_v31  ;;  %3681 = vmatprep.subr.bf16.mxu0 %v4091_v1 }
 0xe5b   :  { %3677 = vmatpush3.bf16.msra.mxu1 %v4327_v3  ;;  %3464 = vmatprep.mubr.msk.f32.mxu1 %vm4092_vm0, %v4093_v2 }
 0xe5c   :  { %3678 = vmatprep.subr.bf16.mxu1 %v4091_v1 }
 0xe5f   :  { %3680 = vmatpush3.bf16.msra.mxu1 %v4335_v9 }
 0xe60   :  { %3687 = vmatprep.subr.bf16.mxu1 %v4091_v1 }
 0xf25   :  { %v1684_v6 = vpop.f32.mrb[12].mxu1 }
 0xf26   :  { %v3422_v35 = vpop.f32.mrb[13].mxu1  ;;  %v1759_v36 = vpop.f32.mrb[14].mxu0  ;;  %v1685_v45 = vadd.f32 %v4382_v40, %v1684_v6 }
 0xf27   :  { %v1770_v39 = vadd.f32 %v1759_v36, %v4376_v34  ;;  %v3433_v19 = vpop.f32.mrb[15].mxu0  ;;  %v1916_v35 = vrot.slane %v4553_v17, 7 }
 0xf28   :  { %v1763_v48 = vadd.f32 %v1759_v36, %v1685_v45 }
 0xf29   :  { %1772 = vrot.lane.b32.xlu1 %v1770_v39, %s4095_s4 }
 0xf2a   :  { %v3104_v49 = vmul.f32 -1.442695, %v1763_v48 }
 0xf2c   :  { %3835 = vpow2.f32 %v3104_v49 }
 0xf2d   :  { %v1856_v23 = vpop.f32.mrb[14].mxu1 }
 0xf2e   :  { %v1879_v41 = vadd.f32 %v1856_v23, %v4298_v27  ;;  %v3444_v42 = vpop.f32.mrb[15].mxu1  ;;  %v1861_v50 = vrot.slane %v1856_v23, 3  ;;  %v1862_v32 = vrot.slane %v1856_v23, 4 }
 0xf30   :  { %v1881_v43 = vrot.slane %v1879_v41, 3  ;;  %v1882_v44 = vrot.slane %v1879_v41, 4  ;;  %v1865_v51 = vadd.f32 %v1861_v50, %v4303_v37  ;;  %v1866_v29 = vadd.f32 %v1862_v32, %v4305_v38 }
 0xf32   :  { %1883 = vrot.lane.b32.xlu0 %v1881_v43, %s4095_s4  ;;  %1885 = vrot.lane.b32.xlu1 %v1882_v44, %s4095_s4  ;;  %v3106_v53 = vmul.f32 -1.442695, %v1865_v51  ;;  %v3107_v54 = vmul.f32 -1.442695, %v1866_v29 }
 0xf34   :  { %3837 = vpow2.f32 %v3106_v53 }
 0xf35   :  { %3839 = vpow2.f32 %v3107_v54 }
 0xf36   :  { %v3836_v55 = vpop.eup %3835 }
 0xf37   :  { %v1767_v22 = vadd.f32 1.0, %v3836_v55 }
 0xf39   :  { %3841 = vrcp.f32 %v1767_v22 }
 0xf3e   :  { %v3838_v56 = vpop.eup %3837 }
 0xf3f   :  { %v3840_v57 = vpop.eup %3839  ;;  %v1873_v58 = vadd.f32 1.0, %v3838_v56 }
 0xf40   :  { %v1874_v40 = vadd.f32 1.0, %v3840_v57 }
 0xf41   :  { %3843 = vrcp.f32 %v1873_v58  ;;  %v4644_v58 = vld [vmem:[#allocation10] ss:$0 sm:$0xff] }
 0xf42   :  { %3845 = vrcp.f32 %v1874_v40 }
 0xf43   :  { %v3842_v59 = vpop.eup %3841 }
 0xf44   :  { %v1782_v63 = vsub.f32 1.0, %v3842_v59  ;;  %v1788_v60 = vmul.f32 %v3842_v59, %v4560_v28 }
 0xf4b   :  { %v3844_v4 = vpop.eup %3843 }
 0xf4c   :  { %v3846_v47 = vpop.eup %3845  ;;  %v1903_v6 = vsub.f32 1.0, %v3844_v4  ;;  %v1919_v23 = vmul.f32 %v3844_v4, %v1915_v33 }
 0xf4d   :  { %v1904_v36 = vsub.f32 1.0, %v3846_v47  ;;  %v1920_v42 = vmul.f32 %v3846_v47, %v1916_v35 }
 0xf9b   :  { %v1773_v62 = vpop.permute.xlu1 %1772 }
 0xf9c   :  { %v1775_v0 = vmul.f32 %v3842_v59, %v1773_v62 }
 0xf9e   :  { %1777 = vrot.lane.b32.xlu0 %v1775_v0, %s4095_s4 }
 0xfa4   :  { %v1884_v5 = vpop.permute.xlu0 %1883  ;;  %v1886_v46 = vpop.permute.xlu1 %1885 }
 0xfa5   :  { %v1889_v8 = vmul.f32 %v3844_v4, %v1884_v5  ;;  %v1890_v10 = vmul.f32 %v3846_v47, %v1886_v46 }
 0xfa7   :  { %1893 = vrot.lane.b32.xlu1 %v1889_v8, %s4095_s4  ;;  %1895 = vrot.lane.b32.xlu0 %v1890_v10, %s4095_s4 }
0x1010   :  { %v1778_v11 = vpop.permute.xlu0 %1777 }
0x1011   :  { %v1780_v52 = vadd.f32 %v1778_v11, %v1685_v45 }
0x1013   :  { %3847 = vtanh.f32 %v1780_v52 }
0x1019   :  { %v1894_v12 = vpop.permute.xlu1 %1893  ;;  %v1896_v14 = vpop.permute.xlu0 %1895 }
0x101a   :  { %v1899_v15 = vadd.f32 %v1894_v12, %v4303_v37  ;;  %v1900_v16 = vadd.f32 %v1896_v14, %v4305_v38 }
0x101c   :  { %3849 = vtanh.f32 %v1899_v15 }
0x101d   :  { %v3848_v21 = vpop.eup %3847  ;;  %3851 = vtanh.f32 %v1900_v16 }
0x101e   :  { %1784 = vrot.lane.b32.xlu1 %v3848_v21, %s4096_s21 }
0x1026   :  { %v3850_v24 = vpop.eup %3849 }
0x1027   :  { %v3852_v25 = vpop.eup %3851  ;;  %1907 = vrot.lane.b32.xlu0 %v3850_v24, %s4096_s21 }
0x1028   :  { %1909 = vrot.lane.b32.xlu1 %v3852_v25, %s4096_s21 }
0x1090   :  { %v1785_v26 = vpop.permute.xlu1 %1784 }
0x1091   :  { %v1787_v30 = vmul.f32 %v1785_v26, %v1782_v63 }
0x1093   :  { %v4604_v31 = vadd.f32 %v1788_v60, %v1787_v30 }
0x1095   :  { %2003 = vrot.lane.b32.xlu0 %v4604_v31, %s4096_s21 }
0x1099   :  { %v1908_v39 = vpop.permute.xlu0 %1907 }
0x109a   :  { %v1910_v19 = vpop.permute.xlu1 %1909  ;;  %v1913_v41 = vmul.f32 %v1908_v39, %v1903_v6 }
0x109b   :  { %v1914_v43 = vmul.f32 %v1910_v19, %v1904_v36 }
0x109c   :  { %v4610_v44 = vadd.f32 %v1919_v23, %v1913_v41 }
0x109d   :  { %v4612_v28 = vadd.f32 %v1920_v42, %v1914_v43 }
0x109e   :  { %v1925_v45 = vrot.slane %v4610_v44, 5 }
0x109f   :  { %v1926_v48 = vrot.slane %v4612_v28, 4 }
0x10a1   :  { %v1927_v18 = vsel %vm362_vm1, %v1926_v48, %v1925_v45 }
0x10a2   :  { %1928 = vrot.lane.b32.xlu1 %v1927_v18, %s4096_s21 }
0x1107   :  { %v2004_v17 = vpop.permute.xlu0 %2003 }
0x1108   :  { %3465 = vmatmul.mubr.msk.f32.vlgmr.msra.gmra.mrb[16].mxu1 %vm225_vm2, %v2004_v17 }
0x1109   :  { %3689 = vmatpush3.bf16.msra.mxu1 %v4319_v61  ;;  %3486 = vmatprep.mubr.msk.f32.mxu1 %vm4092_vm0, %v4093_v2 }
0x110a   :  { %3690 = vmatprep.subr.bf16.mxu1 %v4091_v1 }
0x110d   :  { %3692 = vmatpush3.bf16.msra.mxu1 %v4330_v7 }
0x110e   :  { %3699 = vmatprep.subr.bf16.mxu1 %v4091_v1 }
0x1114   :  { %v1929_v49 = vpop.permute.xlu1 %1928 }
0x1115   :  { %3454 = vmatmul.mubr.msk.f32.vlgmr.msra.gmra.mrb[16].mxu0 %vm225_vm2, %v1929_v49 }
0x1116   :  { %3683 = vmatpush3.bf16.msra.mxu0 %v4280_v13  ;;  %3475 = vmatprep.mubr.msk.f32.mxu0 %vm4092_vm0, %v4093_v2 }
0x1117   :  { %3684 = vmatprep.subr.bf16.mxu0 %v4091_v1 }
0x111a   :  { %3686 = vmatpush3.bf16.msra.mxu0 %v4290_v20 }
0x111b   :  { %3693 = vmatprep.subr.bf16.mxu0 %v4091_v1 }
0x111d   :  { %3476 = vmatmul.mubr.msk.f32.vlgmr.msra.gmra.mrb[18].mxu0 %vm225_vm2, %v1929_v49 }
0x111e   :  { %3695 = vmatpush3.bf16.msra.mxu0 %v4327_v3  ;;  %3497 = vmatprep.mubr.msk.f32.mxu0 %vm4092_vm0, %v4093_v2 }
0x111f   :  { %3696 = vmatprep.subr.bf16.mxu0 %v4091_v1 }
0x1122   :  { %3698 = vmatpush3.bf16.msra.mxu0 %v4335_v9 }
0x1123   :  { %3705 = vmatprep.subr.bf16.mxu0 %v4091_v1 }
0x11db   :  { %v2073_v50 = vpop.f32.mrb[16].mxu1 }
0x11dc   :  { %v2084_v32 = vadd.f32 %v2073_v50, %v4376_v34  ;;  %v3466_v51 = vpop.f32.mrb[17].mxu1 }
0x11dd   :  { %v2229_v51 = vrot.slane %v4610_v44, 7 }
0x11de   :  { %2086 = vrot.lane.b32.xlu0 %v2084_v32, %s4095_s4 }
0x11e8   :  { %v1998_v29 = vpop.f32.mrb[16].mxu0 }
0x11e9   :  { %v3455_v53 = vpop.f32.mrb[17].mxu0  ;;  %v1999_v40 = vadd.f32 %v4644_v58, %v1998_v29 }
0x11eb   :  { %v2077_v59 = vadd.f32 %v2073_v50, %v1999_v40  ;;  %v2230_v50 = vrot.slane %v4612_v28, 7 }
0x11ed   :  { %v3110_v62 = vmul.f32 -1.442695, %v2077_v59 }
0x11ef   :  { %3853 = vpow2.f32 %v3110_v62 }
0x11f0   :  { %v2170_v54 = vpop.f32.mrb[18].mxu0 }
0x11f1   :  { %v2193_v55 = vadd.f32 %v2170_v54, %v4298_v27  ;;  %v3477_v22 = vpop.f32.mrb[19].mxu0  ;;  %v2175_v4 = vrot.slane %v2170_v54, 2  ;;  %v2176_v47 = vrot.slane %v2170_v54, 3 }
0x11f3   :  { %v2196_v56 = vrot.slane %v2193_v55, 3  ;;  %v2195_v57 = vrot.slane %v2193_v55, 2  ;;  %v2179_v46 = vadd.f32 %v2175_v4, %v4303_v37  ;;  %v2180_v8 = vadd.f32 %v2176_v47, %v4305_v38 }
0x11f5   :  { %2199 = vrot.lane.b32.xlu0 %v2196_v56, %s4095_s4  ;;  %2197 = vrot.lane.b32.xlu1 %v2195_v57, %s4095_s4  ;;  %v3112_v10 = vmul.f32 -1.442695, %v2179_v46  ;;  %v3113_v11 = vmul.f32 -1.442695, %v2180_v8 }
0x11f9   :  { %v3854_v0 = vpop.eup %3853 }
0x11fa   :  { %v2081_v5 = vadd.f32 1.0, %v3854_v0 }
0x11fc   :  { %3855 = vrcp.f32 %v2081_v5 }
0x11fd   :  { %3857 = vpow2.f32 %v3112_v10 }
0x11fe   :  { %3859 = vpow2.f32 %v3113_v11 }
0x1206   :  { %v3856_v52 = vpop.eup %3855 }
0x1207   :  { %v3858_v15 = vpop.eup %3857  ;;  %v2096_v45 = vsub.f32 1.0, %v3856_v52  ;;  %v2102_v18 = vmul.f32 %v3856_v52, %v4604_v31 }
0x1208   :  { %v3860_v16 = vpop.eup %3859  ;;  %v2187_v21 = vadd.f32 1.0, %v3858_v15 }
0x1209   :  { %v2188_v24 = vadd.f32 1.0, %v3860_v16 }
0x120a   :  { %3861 = vrcp.f32 %v2187_v21 }
0x120b   :  { %3863 = vrcp.f32 %v2188_v24 }
0x1214   :  { %v3862_v25 = vpop.eup %3861 }
0x1215   :  { %v3864_v63 = vpop.eup %3863  ;;  %v2217_v29 = vsub.f32 1.0, %v3862_v25  ;;  %v2233_v56 = vmul.f32 %v3862_v25, %v2229_v51 }
0x1216   :  { %v2218_v32 = vsub.f32 1.0, %v3864_v63  ;;  %v2234_v55 = vmul.f32 %v3864_v63, %v2230_v50 }
0x1250   :  { %v2087_v12 = vpop.permute.xlu0 %2086 }
0x1251   :  { %v2089_v14 = vmul.f32 %v3856_v52, %v2087_v12 }
0x1253   :  { %2091 = vrot.lane.b32.xlu1 %v2089_v14, %s4095_s4 }
0x1267   :  { %v2200_v26 = vpop.permute.xlu0 %2199  ;;  %v2198_v60 = vpop.permute.xlu1 %2197 }
0x1268   :  { %v2204_v30 = vmul.f32 %v3864_v63, %v2200_v26  ;;  %v2203_v33 = vmul.f32 %v3862_v25, %v2198_v60 }
0x126a   :  { %2209 = vrot.lane.b32.xlu1 %v2204_v30, %s4095_s4  ;;  %2207 = vrot.lane.b32.xlu0 %v2203_v33, %s4095_s4 }
0x12c5   :  { %v2092_v6 = vpop.permute.xlu1 %2091 }
0x12c6   :  { %v2094_v35 = vadd.f32 %v2092_v6, %v1999_v40 }
0x12c8   :  { %3865 = vtanh.f32 %v2094_v35 }
0x12d2   :  { %v3866_v36 = vpop.eup %3865 }
0x12d3   :  { %2098 = vrot.lane.b32.xlu0 %v3866_v36, %s4096_s21 }
0x12dc   :  { %v2210_v39 = vpop.permute.xlu1 %2209  ;;  %v2208_v19 = vpop.permute.xlu0 %2207 }
0x12dd   :  { %v2214_v23 = vadd.f32 %v2210_v39, %v4305_v38  ;;  %v2213_v41 = vadd.f32 %v2208_v19, %v4303_v37 }
0x12df   :  { %3867 = vtanh.f32 %v2214_v23 }
0x12e0   :  { %3869 = vtanh.f32 %v2213_v41 }
0x12e9   :  { %v3868_v42 = vpop.eup %3867 }
0x12ea   :  { %v3870_v43 = vpop.eup %3869  ;;  %2223 = vrot.lane.b32.xlu0 %v3868_v42, %s4096_s21 }
0x12eb   :  { %2221 = vrot.lane.b32.xlu1 %v3870_v43, %s4096_s21 }
0x1345   :  { %v2099_v48 = vpop.permute.xlu0 %2098 }
0x1346   :  { %v2101_v17 = vmul.f32 %v2099_v48, %v2096_v45 }
0x1348   :  { %v4658_v49 = vadd.f32 %v2102_v18, %v2101_v17 }
0x134a   :  { %2317 = vrot.lane.b32.xlu1 %v4658_v49, %s4096_s21 }
0x135c   :  { %v2224_v53 = vpop.permute.xlu0 %2223 }
0x135d   :  { %v2222_v54 = vpop.permute.xlu1 %2221  ;;  %v2228_v22 = vmul.f32 %v2224_v53, %v2218_v32 }
0x135e   :  { %v2227_v57 = vmul.f32 %v2222_v54, %v2217_v29 }
0x135f   :  { %v4664_v40 = vadd.f32 %v2234_v55, %v2228_v22 }
0x1360   :  { %v4666_v31 = vadd.f32 %v2233_v56, %v2227_v57 }
0x1361   :  { %v2240_v59 = vrot.slane %v4664_v40, 5  ;;  %v2544_v56 = vrot.slane %v4664_v40, 7  ;;  %v2732_v40 = vld [vmem:[%s4786_s9] sm:$0xff] }
0x1362   :  { %v2239_v62 = vrot.slane %v4666_v31, 6 }
0x1364   :  { %v2241_v28 = vsel %vm362_vm1, %v2240_v59, %v2239_v62 }
0x1365   :  { %2242 = vrot.lane.b32.xlu0 %v2241_v28, %s4096_s21 }
0x13bc   :  { %v2318_v44 = vpop.permute.xlu1 %2317 }
0x13bd   :  { %3498 = vmatmul.mubr.msk.f32.vlgmr.msra.gmra.mrb[20].mxu0 %vm225_vm2, %v2318_v44 }
0x13be   :  { %3707 = vmatpush3.bf16.msra.mxu0 %v4319_v61  ;;  %3519 = vmatprep.mubr.msk.f32.mxu0 %vm4092_vm0, %v4093_v2 }
0x13bf   :  { %3708 = vmatprep.subr.bf16.mxu0 %v4091_v1 }
0x13c2   :  { %3710 = vmatpush3.bf16.msra.mxu0 %v4330_v7 }
0x13c3   :  { %3717 = vmatprep.subr.bf16.mxu0 %v4091_v1 }
0x13d7   :  { %v2243_v0 = vpop.permute.xlu0 %2242 }
0x13d8   :  { %3487 = vmatmul.mubr.msk.f32.vlgmr.msra.gmra.mrb[18].mxu1 %vm225_vm2, %v2243_v0 }
0x13d9   :  { %3701 = vmatpush3.bf16.msra.mxu1 %v4280_v13  ;;  %3508 = vmatprep.mubr.msk.f32.mxu1 %vm4092_vm0, %v4093_v2 }
0x13da   :  { %3702 = vmatprep.subr.bf16.mxu1 %v4091_v1 }
0x13dd   :  { %3704 = vmatpush3.bf16.msra.mxu1 %v4290_v20 }
0x13de   :  { %3711 = vmatprep.subr.bf16.mxu1 %v4091_v1 }
0x13e0   :  { %3509 = vmatmul.mubr.msk.f32.vlgmr.msra.gmra.mrb[20].mxu1 %vm225_vm2, %v2243_v0 }
0x13e1   :  { %3713 = vmatpush3.bf16.msra.mxu1 %v4327_v3  ;;  %3530 = vmatprep.mubr.msk.f32.mxu1 %vm4092_vm0, %v4093_v2 }
0x13e2   :  { %3714 = vmatprep.subr.bf16.mxu1 %v4091_v1 }
0x13e5   :  { %3716 = vmatpush3.bf16.msra.mxu1 %v4335_v9 }
0x13e6   :  { %3723 = vmatprep.subr.bf16.mxu1 %v4091_v1 }
0x1490   :  { %v2387_v13 = vpop.f32.mrb[20].mxu0 }
0x1491   :  { %v2398_v61 = vadd.f32 %v2387_v13, %v4376_v34  ;;  %v3499_v7 = vpop.f32.mrb[21].mxu0 }
0x1493   :  { %2400 = vrot.lane.b32.xlu1 %v2398_v61, %s4095_s4 }
0x14ab   :  { %v2312_v20 = vpop.f32.mrb[18].mxu1 }
0x14ac   :  { %v3488_v4 = vpop.f32.mrb[19].mxu1  ;;  %v2313_v9 = vadd.f32 %v4644_v58, %v2312_v20 }
0x14ae   :  { %v2391_v10 = vadd.f32 %v2387_v13, %v2313_v9 }
0x14b0   :  { %v3116_v11 = vmul.f32 -1.442695, %v2391_v10  ;;  %v2737_v10 = vld [vmem:[#allocation13] sm:$0xff] }
0x14b2   :  { %3871 = vpow2.f32 %v3116_v11  ;;  %v2738_v11 = vld [vmem:[#allocation13 + $0x8] sm:$0xff] }
0x14b3   :  { %v2484_v47 = vpop.f32.mrb[20].mxu1 }
0x14b4   :  { %v2507_v3 = vadd.f32 %v2484_v47, %v4298_v27  ;;  %v3510_v5 = vpop.f32.mrb[21].mxu1  ;;  %v2489_v14 = vrot.slane %v2484_v47, 1  ;;  %v2490_v15 = vrot.slane %v2484_v47, 2 }
0x14b5   :  { %v2734_v5 = vld [vmem:[%s4786_s9 + $0x10] sm:$0xff] }
0x14b6   :  { %v2509_v46 = vrot.slane %v2507_v3, 1  ;;  %v2510_v8 = vrot.slane %v2507_v3, 2  ;;  %v2493_v27 = vadd.f32 %v2489_v14, %v4303_v37  ;;  %v2494_v25 = vadd.f32 %v2490_v15, %v4305_v38 }
0x14b8   :  { %2511 = vrot.lane.b32.xlu0 %v2509_v46, %s4095_s4  ;;  %2513 = vrot.lane.b32.xlu1 %v2510_v8, %s4095_s4  ;;  %v3118_v63 = vmul.f32 -1.442695, %v2493_v27  ;;  %v3119_v26 = vmul.f32 -1.442695, %v2494_v25  ;;  %v2735_v46 = vld [vmem:[%s4786_s9 + $0x18] sm:$0xff] }
0x14bc   :  { %v3872_v52 = vpop.eup %3871 }
0x14bd   :  { %v2395_v12 = vadd.f32 1.0, %v3872_v52  ;;  %v3724_v52 = vpack.c.bf16 %v2738_v11, %v2737_v10 }
0x14bf   :  { %3873 = vrcp.f32 %v2395_v12  ;;  %v2739_v12 = vld [vmem:[#allocation13 + $0x10] sm:$0xf] }
0x14c0   :  { %3875 = vpow2.f32 %v3118_v63 }
0x14c1   :  { %3877 = vpow2.f32 %v3119_v26 }
0x14c9   :  { %v3874_v16 = vpop.eup %3873 }
0x14ca   :  { %v3876_v60 = vpop.eup %3875  ;;  %v2410_v29 = vsub.f32 1.0, %v3874_v16  ;;  %v2416_v54 = vmul.f32 %v3874_v16, %v4658_v49 }
0x14cb   :  { %v3878_v30 = vpop.eup %3877  ;;  %v2501_v33 = vadd.f32 1.0, %v3876_v60 }
0x14cc   :  { %v2502_v6 = vadd.f32 1.0, %v3878_v30 }
0x14cd   :  { %3879 = vrcp.f32 %v2501_v33 }
0x14ce   :  { %3881 = vrcp.f32 %v2502_v6 }
0x14d7   :  { %v3880_v35 = vpop.eup %3879 }
0x14d8   :  { %v3882_v36 = vpop.eup %3881 }
0x14d9   :  { %v2532_v57 = vsub.f32 1.0, %v3882_v36  ;;  %v2548_v0 = vmul.f32 %v3882_v36, %v2544_v56 }
0x1505   :  { %v2401_v21 = vpop.permute.xlu1 %2400 }
0x1506   :  { %v2403_v24 = vmul.f32 %v3874_v16, %v2401_v21 }
0x1508   :  { %2405 = vrot.lane.b32.xlu0 %v2403_v24, %s4095_s4  ;;  %v3123_v24 = vld [vmem:[%s4787_s10] ss:$0 sm:$0xff] }
0x152a   :  { %v2512_v39 = vpop.permute.xlu0 %2511  ;;  %v2514_v19 = vpop.permute.xlu1 %2513 }
0x152b   :  { %v2517_v23 = vmul.f32 %v3880_v35, %v2512_v39  ;;  %v2518_v41 = vmul.f32 %v3882_v36, %v2514_v19 }
0x152d   :  { %2521 = vrot.lane.b32.xlu1 %v2517_v23, %s4095_s4  ;;  %2523 = vrot.lane.b32.xlu0 %v2518_v41, %s4095_s4 }
0x157a   :  { %v2406_v42 = vpop.permute.xlu0 %2405 }
0x157b   :  { %v2408_v43 = vadd.f32 %v2406_v42, %v2313_v9  ;;  %v3721_v9 = vpack.c.bf16 %v2735_v46, %v2734_v5 }
0x157d   :  { %3883 = vtanh.f32 %v2408_v43 }
0x1587   :  { %v3884_v45 = vpop.eup %3883 }
0x1588   :  { %2412 = vrot.lane.b32.xlu1 %v3884_v45, %s4096_s21 }
0x159f   :  { %v2522_v48 = vpop.permute.xlu1 %2521  ;;  %v2524_v18 = vpop.permute.xlu0 %2523 }
0x15a0   :  { %v2527_v17 = vadd.f32 %v2522_v48, %v4303_v37  ;;  %v2528_v50 = vadd.f32 %v2524_v18, %v4305_v38  ;;  %v2543_v37 = vrot.slane %v4666_v31, 7  ;;  %v2531_v38 = vsub.f32 1.0, %v3880_v35  ;;  %v2733_v31 = vld [vmem:[%s4786_s9 + $0x8] sm:$0xff] }
0x15a1   :  { %v3718_v3 = vpack.c.bf16 %v2733_v31, %v2732_v40 }
0x15a2   :  { %3885 = vtanh.f32 %v2527_v17  ;;  %v2547_v28 = vmul.f32 %v3880_v35, %v2543_v37 }
0x15a3   :  { %3887 = vtanh.f32 %v2528_v50 }
0x15ac   :  { %v3886_v32 = vpop.eup %3885 }
0x15ad   :  { %v3888_v51 = vpop.eup %3887  ;;  %2535 = vrot.lane.b32.xlu0 %v3886_v32, %s4096_s21 }
0x15ae   :  { %2537 = vrot.lane.b32.xlu1 %v3888_v51, %s4096_s21 }
0x15fa   :  { %v2413_v53 = vpop.permute.xlu1 %2412 }
0x15fb   :  { %v2415_v55 = vmul.f32 %v2413_v53, %v2410_v29 }
0x15fd   :  { %v4710_v22 = vadd.f32 %v2416_v54, %v2415_v55 }
0x15ff   :  { %2631 = vrot.lane.b32.xlu0 %v4710_v22, %s4096_s21 }
0x161f   :  { %v2536_v59 = vpop.permute.xlu0 %2535 }
0x1620   :  { %v2538_v62 = vpop.permute.xlu1 %2537  ;;  %v2541_v44 = vmul.f32 %v2536_v59, %v2531_v38 }
0x1621   :  { %v2542_v13 = vmul.f32 %v2538_v62, %v2532_v57 }
0x1622   :  { %v2549_v61 = vadd.f32 %v2547_v28, %v2541_v44 }
0x1623   :  { %v2550_v49 = vadd.f32 %v2548_v0, %v2542_v13 }
0x1624   :  { %v2553_v7 = vrot.slane %v2549_v61, 7 }
0x1625   :  { %v2554_v20 = vrot.slane %v2550_v49, 6 }
0x1627   :  { %v2555_v4 = vsel %vm362_vm1, %v2554_v20, %v2553_v7 }
0x1628   :  { %2556 = vrot.lane.b32.xlu1 %v2555_v4, %s4096_s21 }
0x1671   :  { %v2632_v47 = vpop.permute.xlu0 %2631 }
0x1672   :  { %3531 = vmatmul.mubr.msk.f32.vlgmr.msra.gmra.mrb[22].mxu1 %vm225_vm2, %v2632_v47 }
0x1673   :  { %3550 = vmatprep.mubr.msk.f32.mxu1 %vm4092_vm0, %v4093_v2  ;;  %3725 = vmatpush3.bf16.msra.mxu1 %v3724_v52 }
0x1674   :  { %3548 = vmatprep.subr.mxu1 %v4093_v2 }
0x1677   :  { %3549 = vmatpush3.msk.msra.mxu1 %vm2828_vm3, %v2739_v12 }
0x1678   :  { %3726 = vmatprep.subr.bf16.mxu1 %v4091_v1 }
0x169a   :  { %v2557_v8 = vpop.permute.xlu1 %2556 }
0x169b   :  { %3520 = vmatmul.mubr.msk.f32.vlgmr.msra.gmra.mrb[22].mxu0 %vm225_vm2, %v2557_v8 }
0x169c   :  { %3719 = vmatpush3.bf16.msra.mxu0 %v3718_v3  ;;  %3541 = vmatprep.mubr.msk.f32.mxu0 %vm4092_vm0, %v4093_v2 }
0x169d   :  { %3720 = vmatprep.subr.bf16.mxu0 %v4091_v1 }
0x16a0   :  { %3722 = vmatpush3.bf16.msra.mxu0 %v3721_v9 }
0x16a1   :  { %3732 = vmatprep.subr.bf16.mxu0 %v4091_v1 }
0x16a3   :  { %3542 = vmatmul.mubr.msk.f32.vlgmr.msra.gmra.mrb[24].mxu0 %vm225_vm2, %v2557_v8 }
0x16a4   :  { %3570 = vmatprep.mubr.msk.f32.mxu0 %vm4092_vm0, %v4093_v2  ;;  %3734 = vmatpush3.bf16.msra.mxu0 %v3724_v52 }
0x16a5   :  { %3568 = vmatprep.subr.mxu0 %v4093_v2 }
0x16a8   :  { %3569 = vmatpush3.msk.msra.mxu0 %vm2828_vm3, %v2739_v12 }
0x1745   :  { %v2701_v14 = vpop.f32.mrb[22].mxu1 }
0x1746   :  { %v2712_v15 = vadd.f32 %v2701_v14, %v4376_v34  ;;  %v3532_v16 = vpop.f32.mrb[23].mxu1 }
0x1748   :  { %2714 = vrot.lane.b32.xlu0 %v2712_v15, %s4095_s4 }
0x176e   :  { %v2626_v21 = vpop.f32.mrb[22].mxu0 }
0x176f   :  { %v3521_v27 = vpop.f32.mrb[23].mxu0  ;;  %v2627_v34 = vadd.f32 %v4644_v58, %v2626_v21 }
0x1771   :  { %v2705_v30 = vadd.f32 %v2701_v14, %v2627_v34 }
0x1773   :  { %v3122_v33 = vmul.f32 -1.442695, %v2705_v30 }
0x1775   :  { %3889 = vpow2.f32 %v3122_v33 }
0x1776   :  { %v2813_v25 = vpop.f32.mrb[24].mxu0 }
0x1777   :  { %v2814_v63 = vadd.f32 %v3123_v24, %v2813_v25  ;;  %v3543_v26 = vpop.f32.mrb[25].mxu0 }
0x1779   :  { %v2817_v60 = vmax.f32 %v2814_v63, 0.0 }
0x177b   :  { %3551 = vmatmul.mubr.msk.f32.vlgmr.msra.gmra.mrb[24].mxu1 %vm2824_vm4, %v2817_v60 }
0x177c   :  { %3728 = vmatpush3.bf16.msra.mxu1 %v3718_v3  ;;  %3561 = vmatprep.mubr.msk.f32.mxu1 %vm4092_vm0, %v4093_v2 }
0x177d   :  { %3729 = vmatprep.subr.bf16.mxu1 %v4091_v1  ;;  %v3125_v1 = vld [vmem:[%s4789_s12] ss:$0 sm:$0xff]  ;;  %s4097_s12 = smov [#allocation14]  }
0x177e   :  { %s3060_s8 = sshll.u32 %s4097_s12, 4  ;;  %s3061_s8 = int_to_ptr.vmem [resolvable:$true] %s3060_s8 }
0x177f   :  { %v3890_v6 = vpop.eup %3889  ;;  %s4050_s19 = scalar_lea.vmem %s3061_s8, 64  ;;  %p4055_p1 = scmp.lt.s32.totalorder %s3061_s8, %s3061_s8 }
0x1780   :  { %3731 = vmatpush3.bf16.msra.mxu1 %v3721_v9  ;;  %v2709_v35 = vadd.f32 1.0, %v3890_v6  ;;  %p4051_p0 = scmp.ne.s32.totalorder %s3061_s8, %s4050_s19  ;;  %p4056_p2 = scmp.lt.s32.totalorder %s4050_s19, %s4050_s19 }
0x1782   :  { %3891 = vrcp.f32 %v2709_v35  ;;  %p4057_p3 = por %p4056_p2, %p4055_p1 }
0x1784   :  { %p4058_p4 = pnand %p4057_p3, %p4051_p0 }
0x178c   :  { %v3892_v36 = vpop.eup %3891 }
0x178d   :  { %v2724_v45 = vsub.f32 1.0, %v3892_v36  ;;  %v2730_v18 = vmul.f32 %v3892_v36, %v4710_v22 }
0x17ba   :  { %v2715_v39 = vpop.permute.xlu0 %2714 }
0x17bb   :  { %v2717_v19 = vmul.f32 %v3892_v36, %v2715_v39 }
0x17bd   :  { %2719 = vrot.lane.b32.xlu1 %v2717_v19, %s4095_s4 }
0x182f   :  { %v2720_v23 = vpop.permute.xlu1 %2719 }
0x1830   :  { %v2722_v41 = vadd.f32 %v2720_v23, %v2627_v34 }
0x1832   :  { %3893 = vtanh.f32 %v2722_v41 }
0x183c   :  { %v3894_v2 = vpop.eup %3893 }
0x183d   :  { %2726 = vrot.lane.b32.xlu0 %v3894_v2, %s4096_s21 }
0x184e   :  { %v2898_v58 = vpop.f32.mrb[24].mxu1 }
0x184f   :  { %v2899_v42 = vadd.f32 %v3125_v1, %v2898_v58  ;;  %v3552_v43 = vpop.f32.mrb[25].mxu1 }
0x1851   :  { %2903 = vst.msk [vmem:[#allocation14] sm:$0x3] %vm2902_vm5, %v2899_v42 }
0x18af   :  { %v2727_v48 = vpop.permute.xlu0 %2726 }
0x18b0   :  { %v2729_v17 = vmul.f32 %v2727_v48, %v2724_v45 }
0x18b2   :  { %v2731_v50 = vadd.f32 %v2730_v18, %v2729_v17 }
0x18b4   :  { %2905 = vrot.lane.b32.xlu1 %v2731_v50, %s4096_s21 }
0x1926   :  { %v2906_v32 = vpop.permute.xlu1 %2905 }
0x1927   :  { %3562 = vmatmul.mubr.msk.f32.vlgmr.msra.gmra.mrb[26].mxu1 %vm225_vm2, %v2906_v32 }
0x19fa   :  { %v2975_v51 = vpop.f32.mrb[26].mxu1 }
0x19fb   :  { %v2976_v29 = vadd.f32 %v3123_v24, %v2975_v51  ;;  %v3563_v53 = vpop.f32.mrb[27].mxu1 }
0x19fd   :  { %v2979_v54 = vmax.f32 %v2976_v29, 0.0 }
0x19ff   :  { %3571 = vmatmul.mubr.msk.f32.vlgmr.msra.gmra.mrb[26].mxu0 %vm2824_vm4, %v2979_v54 }
0x1ad2   :  { %v3049_v55 = vpop.f32.mrb[26].mxu0 }
0x1ad3   :  { %v3050_v37 = vadd.f32 %v3125_v1, %v3049_v55  ;;  %v3572_v38 = vpop.f32.mrb[27].mxu0 }
0x1ad5   :  { %3053 = vst.msk [vmem:[#allocation14 + $0x2] sm:$0x3] %vm2902_vm5, %v3050_v37 }
0x1ad6   :  { %4061 = shalt.err (!%p4058_p4)
}
0x1ad7   :  { %s4062_s14 = scalar_lea.hbm %s4790_s13, 64 }
0x1ad8   :  { %p4063_p5 = scmp.ne.s32.totalorder %s4790_s13, %s4062_s14  ;;  %p4066_p6 = scmp.lt.u32.totalorder %s4062_s14, %s4790_s13 }
0x1ada   :  { %p4068_p7 = pnand %p4066_p6, %p4063_p5 }
0x1adc   :  { %4071 = shalt.err (!%p4068_p7)
}
0x1add   :  { %3063 = dma.vmem_to_hbm [thread:$0]  %s3061_s8, 64, %s4790_s13, [#allocation4]  }
0x1ade   :  { %4080 = dma.done.wait [#allocation4], 64  }
0x1adf   :  { %4081 = vsyncadd [#allocation4], 4294967232 }
0x1ae0   :  { %3067 = vsyncpa [#allocation3], 1 }
0x1ae1   :  { %3068 = vsyncpa [#allocation6], 1 }
0x1ae2   :  { %3069 = vsyncpa [#allocation9], 1 }
0x1ae3   :  { %3070 = vsyncpa [#allocation12], 1 }
0x1ae4   :  { %3071 = vsyncpa [#allocation4], 1 }

</bundles_post_ra>
